<compile_context>
chip_gen: v5e
topology: v5e:2x2
jax: 0.10.0
libtpu: 0.0.40
codegen_flags: <defaults>
</compile_context>

<pallas_src>
import functools

import jax
import jax.numpy as jnp
from jax.experimental import pallas as pl
from jax.experimental.pallas import tpu as pltpu


# Chain positions feeding hq (all question-typed) and their weights.
_POSITIONS = (0, 2, 4, 6, 8)
_WEIGHTS = (1.0, 0.6, 0.4, 0.25, 0.1)


def _round_up(x, m):
    return ((x + m - 1) // m) * m


def _num_tensorcores():
    """Best-effort count of TensorCores sharing a 'parallel' grid axis."""
    try:
        kind = jax.devices()[0].device_kind.lower()
    except Exception:
        return 1
    # v7x (and older megacore chips) expose 2 TensorCores per device;
    # v5e / v6e are single-TC.
    if "7" in kind:
        return 2
    for tag in ("v2", "v3", "v4", "v5p"):
        if tag in kind:
            return 2
    return 1


# ----------------------------- Pallas kernel --------------------------------

def _path_emb_kernel(idx_ref, tblk_ref, out_ref, *, kdim, npos, pack):
    """Fused weighted one-hot gather, lane-packed.

    idx_ref  : [TN4, pack*npos] int32 -- row r holds the 5 question ids of
               logical rows pack*r .. pack*r+pack-1, already offset by u*nq_k
               for packed sub-row u (wrapper pre-adds the offsets).
    tblk_ref : [kdim, pack*d]   f32   -- block-diagonal table
               kron(I_pack, emb_q[:nq_k]); stays VMEM resident across the grid.
    out_ref  : [TN4, pack*d]    f32   -- out[r, u*d:(u+1)*d] = hq[pack*r+u]
               (== row-major reshape of hq, so the wrapper reshape is free).
    """
    idx = idx_ref[...]                                   # [TN4, pack*npos]
    tn4 = idx.shape[0]

    col = jax.lax.broadcasted_iota(jnp.int32, (tn4, kdim), 1)      # [TN4, 128]

    # Weighted one-hot on the VPU (pack*npos compare/select/add passes over a
    # single 128-lane tile), then one MXU matmul against the resident table.
    w1h = jnp.zeros((tn4, kdim), jnp.float32)
    for u in range(pack):
        for j, w in enumerate(_WEIGHTS[:npos]):
            c = u * npos + j
            node = idx[:, c:c + 1]                       # [TN4, 1]
            w1h = w1h + jnp.where(node == col, jnp.float32(w), jnp.float32(0.0))

    out_ref[...] = jnp.dot(
        w1h, tblk_ref[...], preferred_element_type=jnp.float32
    ).astype(out_ref.dtype)


# --------------------------- wrapper around the call -------------------------

def make_packed_table(emb_q):
    """Block-diagonal, 128-lane-contraction kernel table (built once, cached).

    Returns (tblock [pack*nq_k, pack*d], pack, nq_k).
    """
    nq1, d = emb_q.shape
    pack = 128 // d if (128 % d == 0 and d <= 128) else 1
    nq_k = 128 // pack
    if pack > 1 and nq1 > nq_k + 1:
        # Table overflows one 128-lane contraction tile by more than the single
        # (unreachable) sentinel row: give up lane-packing rather than drop
        # real rows.  (Not exercised at this config.)
        pack = 1
    if pack == 1:
        nq_k = max(_round_up(nq1, 128), 128)

    if nq1 < nq_k:
        emb_k = jnp.pad(emb_q, ((0, nq_k - nq1), (0, 0)))
    elif nq1 > nq_k:
        # Trim the sentinel question row (id NUM_Q): real walks started at
        # question ids < NUM_Q never reach it on this graph, and padded index
        # rows use id 0, so the trim is safe.
        emb_k = emb_q[:nq_k]
    else:
        emb_k = emb_q

    tblock = jnp.kron(jnp.eye(pack, dtype=emb_k.dtype), emb_k)   # [kdim, pack*d]
    return tblock, pack, nq_k


def path_weighted_sum(traces5, tblock, *, pack, nq_k, d,
                      block_rows=None, num_cores=1):
    """traces5: [N, 5] int32 (question ids at chain positions 0,2,4,6,8);
    tblock: cached kron'd table.  Returns hq [N, d] f32."""
    n, npos = traces5.shape
    lane_w = pack * d
    kdim = pack * nq_k

    # Logical rows per grid block: multiple of 8*pack (sublane alignment of the
    # packed blocks); ~2048 rows per block at large N, clamped so every
    # TensorCore gets a block and tiny inputs use a single block.
    row_align = 8 * pack
    if block_rows is None:
        per_core = _round_up(pl.cdiv(n, max(num_cores, 1)), row_align)
        block_rows = max(row_align, min(2048, per_core))
    block_rows = _round_up(min(block_rows, _round_up(n, row_align)), row_align)
    n_pad = _round_up(n, block_rows)
    grid = n_pad // block_rows
    tn4 = block_rows // pack

    # Pad with id 0 (valid table row); padded rows are sliced off below.
    # Pre-add the u*nq_k packing offsets so the kernel does no index math.
    idx = jnp.pad(traces5.astype(jnp.int32), ((0, n_pad - n), (0, 0)))
    idx = jnp.reshape(idx, (n_pad // pack, pack, npos))
    offs = (jnp.arange(pack, dtype=jnp.int32) * nq_k)[None, :, None]
    idx_packed = jnp.reshape(idx + offs, (n_pad // pack, pack * npos))

    kernel = functools.partial(_path_emb_kernel, kdim=kdim, npos=npos, pack=pack)

    cost = pl.CostEstimate(
        flops=2 * (n_pad // pack) * kdim * lane_w,
        transcendentals=0,
        bytes_accessed=(idx_packed.size * 4 + tblock.size * 4
                        + (n_pad // pack) * lane_w * 4),
    )

    out = pl.pallas_call(
        kernel,
        out_shape=jax.ShapeDtypeStruct((n_pad // pack, lane_w), tblock.dtype),
        grid=(grid,),
        in_specs=[
            pl.BlockSpec((tn4, pack * npos), lambda i: (i, 0)),
            # Index-invariant full block: table DMA'd once, stays in VMEM.
            pl.BlockSpec((kdim, lane_w), lambda i: (0, 0)),
        ],
        out_specs=pl.BlockSpec((tn4, lane_w), lambda i: (i, 0)),
        compiler_params=pltpu.CompilerParams(
            dimension_semantics=("parallel",)),
        cost_estimate=cost,
    )(idx_packed, tblock)

    # Free (row-major metadata) unpack back to [N, D].
    return jnp.reshape(out, (n_pad, d))[:n]


# ------------------------ synthetic graph + random walk ---------------------

NUM_Q = 32     # questions
NUM_KC = 16    # concepts
NUM_STU = 8    # students
D_MODEL = 32
CHAIN_LEN = 9  # metapath of length 8 -> 9 visited nodes


def build_synthetic_adjacency():
    """Deterministic synthetic versions of M_qkc and M_qs (plus sentinels)."""
    q_ids = jnp.arange(NUM_Q)

    # question -> concept ('contain'): each question touches 2 concepts
    adj_qc = jnp.zeros((NUM_Q + 1, NUM_KC + 1), jnp.int32)
    adj_qc = adj_qc.at[q_ids, q_ids % NUM_KC].set(1)
    adj_qc = adj_qc.at[q_ids, (3 * q_ids + 1) % NUM_KC].set(1)
    adj_qc = adj_qc.at[NUM_Q, NUM_KC].set(1)                 # sentinel edge

    # concept -> question ('contain-ed'): transpose
    adj_cq = adj_qc.T

    # question -> student ('finish-ed'): each question finished by 2 students
    adj_qs = jnp.zeros((NUM_Q + 1, NUM_STU + 1), jnp.int32)
    adj_qs = adj_qs.at[q_ids, q_ids % NUM_STU].set(1)
    adj_qs = adj_qs.at[q_ids, (5 * q_ids + 2) % NUM_STU].set(1)
    adj_qs = adj_qs.at[NUM_Q, NUM_STU].set(1)                # sentinel edge

    # student -> question ('finish'): transpose
    adj_sq = adj_qs.T

    # Sentinel rows have out-edges so the walk never terminates early
    # (and only ever lead back to sentinels, never to real nodes).
    adj_cq = adj_cq.at[NUM_KC, NUM_Q].set(1)
    adj_sq = adj_sq.at[NUM_STU, NUM_Q].set(1)
    return adj_qc, adj_cq, adj_qs, adj_sq


def random_walk(key, start_q, adj_qc, adj_cq, adj_qs, adj_sq):
    """Simulate dgl.sampling.random_walk over the metapath (plain-JAX glue)."""
    adjs = [adj_qc, adj_cq, adj_qs, adj_sq, adj_qc, adj_cq, adj_qs, adj_sq]
    cur = start_q.astype(jnp.int32)
    trace = [cur]
    for adj in adjs:
        key, sub = jax.random.split(key)
        rows = adj[cur]                                            # [N, n_dst]
        logits = jnp.where(rows > 0, 0.0, -jnp.inf)
        cur = jax.random.categorical(sub, logits, axis=-1).astype(jnp.int32)
        trace.append(cur)
    return jnp.stack(trace, axis=-1)                               # [N, 9]


# ------------------------------ forward wrapper ------------------------------

class MyRWGraphPallas:
    def __init__(self, d_model, emb_q, emb_kc, emb_stu):
        self.d_model = d_model
        self.emb_q = emb_q        # [NUM_Q + 1, d_model]
        self.emb_kc = emb_kc      # [NUM_KC + 1, d_model]   (unused by forward)
        self.emb_stu = emb_stu    # [NUM_STU + 1, d_model]  (unused by forward)
        (self.adj_qc, self.adj_cq,
         self.adj_qs, self.adj_sq) = build_synthetic_adjacency()

        # Cached kron'd, 128-lane-contraction kernel table (128x128 f32 here).
        self._tblock, self._pack, self._nq_k = make_packed_table(emb_q)
        self._num_cores = _num_tensorcores()
        # jit the whole forward: at small N the random-walk glue dominates
        # eager dispatch time; under jit it fuses and the table is a constant.
        self._forward_jit = jax.jit(self._forward_impl)

    def _forward_impl(self, x_question, y_knowledge, seq_q, walk_key):
        # x_question, y_knowledge are unused in the reference forward.
        bs, seq_len = seq_q.shape
        flat_q = jnp.reshape(seq_q, (-1,))                         # [bs*seq]
        traces = random_walk(walk_key, flat_q, self.adj_qc, self.adj_cq,
                             self.adj_qs, self.adj_sq)             # [N, 9]
        # Only the question-typed chain positions (0,2,4,6,8) feed hq.
        traces5 = traces[:, ::2]                                   # [N, 5]
        hq_flat = path_weighted_sum(
            traces5, self._tblock, pack=self._pack, nq_k=self._nq_k,
            d=self.d_model, num_cores=self._num_cores)
        hq = jnp.reshape(hq_flat, (bs, seq_len, self.d_model))
        return hq, hq

    def forward(self, x_question, y_knowledge, seq_q, *, walk_key):
        return self._forward_jit(x_question, y_knowledge, seq_q, walk_key)


# ----------------------------------- main ------------------------------------

if __name__ == "__main__":
    key = jax.random.PRNGKey(0)
    k_eq, k_ekc, k_estu, k_seq, k_xq, k_yk, k_walk = jax.random.split(key, 7)

    emb_q = jax.random.normal(k_eq, (NUM_Q + 1, D_MODEL), jnp.float32)
    emb_kc = jax.random.normal(k_ekc, (NUM_KC + 1, D_MODEL), jnp.float32)
    emb_stu = jax.random.normal(k_estu, (NUM_STU + 1, D_MODEL), jnp.float32)

    model = MyRWGraphPallas(D_MODEL, emb_q, emb_kc, emb_stu)

    bs, seq_len = 2, 128
    seq_q = jax.random.randint(k_seq, (bs, seq_len), 0, NUM_Q, jnp.int32)
    x_question = jax.random.randint(k_xq, (bs, seq_len), 0, NUM_Q, jnp.int32)
    y_knowledge = jax.random.randint(k_yk, (bs, seq_len), 0, NUM_KC, jnp.int32)

    hq, hq2 = model.forward(x_question, y_knowledge, seq_q, walk_key=k_walk)
    jax.block_until_ready((hq, hq2))

    # Reference check (plain JAX gather) for the Pallas hot path.
    flat_q = jnp.reshape(seq_q, (-1,))
    traces = random_walk(k_walk, flat_q, model.adj_qc, model.adj_cq,
                         model.adj_qs, model.adj_sq)
    # Invariant backing the sentinel-row trim (kdim=128): question positions
    # of the walk never reference the sentinel row NUM_Q on this graph.
    assert int(jnp.max(traces[:, ::2])) < NUM_Q
    ref = jnp.zeros((bs * seq_len, D_MODEL), jnp.float32)
    for w, pos in zip(_WEIGHTS, _POSITIONS):
        ref = ref + w * emb_q[traces[:, pos]]
    ref = ref.reshape(bs, seq_len, D_MODEL)
    assert jnp.allclose(hq, ref, atol=1e-5), "mismatch vs reference"
    assert jnp.allclose(hq2, ref, atol=1e-5), "mismatch vs reference (hq2)"

    print("KERNEL_OK")
</pallas_src>

<mosaic_0001>
module attributes {stable_mosaic.version = 11 : i64} {
  func.func @_path_emb_kernel(%arg0: i32, %arg1: memref<64x20xi32, #tpu.memory_space<vmem>>, %arg2: memref<128x128xf32, #tpu.memory_space<vmem>>, %arg3: memref<64x128xf32, #tpu.memory_space<vmem>>) attributes {dimension_semantics = [#tpu.dimension_semantics<parallel>], iteration_bounds = array<i64: 1>, scalar_prefetch = 0 : i64, scratch_operands = 0 : i64, tpu.core_type = #tpu.core_type<tc>, window_params = [{transform_indices = @transform_0, window_bounds = array<i64: 64, 20>}, {pipeline_mode = #tpu.pipeline_mode<synchronous>, transform_indices = @transform_1, window_bounds = array<i64: 128, 128>}, {transform_indices = @transform_2, window_bounds = array<i64: 64, 128>}]} {
    %c0 = arith.constant 0 : index
    %c0_0 = arith.constant 0 : index
    %0 = vector.load %arg1[%c0, %c0_0] : memref<64x20xi32, #tpu.memory_space<vmem>>, vector<64x20xi32>
    %1 = tpu.iota {dimensions = array<i32: 1>} : vector<64x128xi32>
    %cst = arith.constant 0.000000e+00 : f32
    %2 = vector.broadcast %cst : f32 to vector<64x128xf32>
    %3 = vector.extract_strided_slice %0 {offsets = [0, 0], sizes = [64, 1], strides = [1, 1]} : vector<64x20xi32> to vector<64x1xi32>
    %4 = vector.broadcast %3 : vector<64x1xi32> to vector<64x128xi32>
    %5 = arith.cmpi eq, %4, %1 : vector<64x128xi32>
    %cst_1 = arith.constant 1.000000e+00 : f32
    %cst_2 = arith.constant 0.000000e+00 : f32
    %6 = vector.broadcast %cst_1 : f32 to vector<64x128xf32>
    %7 = vector.broadcast %cst_2 : f32 to vector<64x128xf32>
    %8 = arith.select %5, %6, %7 : vector<64x128xi1>, vector<64x128xf32>
    %9 = arith.addf %2, %8 : vector<64x128xf32>
    %10 = vector.extract_strided_slice %0 {offsets = [0, 1], sizes = [64, 1], strides = [1, 1]} : vector<64x20xi32> to vector<64x1xi32>
    %11 = vector.broadcast %10 : vector<64x1xi32> to vector<64x128xi32>
    %12 = arith.cmpi eq, %11, %1 : vector<64x128xi32>
    %cst_3 = arith.constant 6.000000e-01 : f32
    %cst_4 = arith.constant 0.000000e+00 : f32
    %13 = vector.broadcast %cst_3 : f32 to vector<64x128xf32>
    %14 = vector.broadcast %cst_4 : f32 to vector<64x128xf32>
    %15 = arith.select %12, %13, %14 : vector<64x128xi1>, vector<64x128xf32>
    %16 = arith.addf %9, %15 : vector<64x128xf32>
    %17 = vector.extract_strided_slice %0 {offsets = [0, 2], sizes = [64, 1], strides = [1, 1]} : vector<64x20xi32> to vector<64x1xi32>
    %18 = vector.broadcast %17 : vector<64x1xi32> to vector<64x128xi32>
    %19 = arith.cmpi eq, %18, %1 : vector<64x128xi32>
    %cst_5 = arith.constant 4.000000e-01 : f32
    %cst_6 = arith.constant 0.000000e+00 : f32
    %20 = vector.broadcast %cst_5 : f32 to vector<64x128xf32>
    %21 = vector.broadcast %cst_6 : f32 to vector<64x128xf32>
    %22 = arith.select %19, %20, %21 : vector<64x128xi1>, vector<64x128xf32>
    %23 = arith.addf %16, %22 : vector<64x128xf32>
    %24 = vector.extract_strided_slice %0 {offsets = [0, 3], sizes = [64, 1], strides = [1, 1]} : vector<64x20xi32> to vector<64x1xi32>
    %25 = vector.broadcast %24 : vector<64x1xi32> to vector<64x128xi32>
    %26 = arith.cmpi eq, %25, %1 : vector<64x128xi32>
    %cst_7 = arith.constant 2.500000e-01 : f32
    %cst_8 = arith.constant 0.000000e+00 : f32
    %27 = vector.broadcast %cst_7 : f32 to vector<64x128xf32>
    %28 = vector.broadcast %cst_8 : f32 to vector<64x128xf32>
    %29 = arith.select %26, %27, %28 : vector<64x128xi1>, vector<64x128xf32>
    %30 = arith.addf %23, %29 : vector<64x128xf32>
    %31 = vector.extract_strided_slice %0 {offsets = [0, 4], sizes = [64, 1], strides = [1, 1]} : vector<64x20xi32> to vector<64x1xi32>
    %32 = vector.broadcast %31 : vector<64x1xi32> to vector<64x128xi32>
    %33 = arith.cmpi eq, %32, %1 : vector<64x128xi32>
    %cst_9 = arith.constant 1.000000e-01 : f32
    %cst_10 = arith.constant 0.000000e+00 : f32
    %34 = vector.broadcast %cst_9 : f32 to vector<64x128xf32>
    %35 = vector.broadcast %cst_10 : f32 to vector<64x128xf32>
    %36 = arith.select %33, %34, %35 : vector<64x128xi1>, vector<64x128xf32>
    %37 = arith.addf %30, %36 : vector<64x128xf32>
    %38 = vector.extract_strided_slice %0 {offsets = [0, 5], sizes = [64, 1], strides = [1, 1]} : vector<64x20xi32> to vector<64x1xi32>
    %39 = vector.broadcast %38 : vector<64x1xi32> to vector<64x128xi32>
    %40 = arith.cmpi eq, %39, %1 : vector<64x128xi32>
    %cst_11 = arith.constant 1.000000e+00 : f32
    %cst_12 = arith.constant 0.000000e+00 : f32
    %41 = vector.broadcast %cst_11 : f32 to vector<64x128xf32>
    %42 = vector.broadcast %cst_12 : f32 to vector<64x128xf32>
    %43 = arith.select %40, %41, %42 : vector<64x128xi1>, vector<64x128xf32>
    %44 = arith.addf %37, %43 : vector<64x128xf32>
    %45 = vector.extract_strided_slice %0 {offsets = [0, 6], sizes = [64, 1], strides = [1, 1]} : vector<64x20xi32> to vector<64x1xi32>
    %46 = vector.broadcast %45 : vector<64x1xi32> to vector<64x128xi32>
    %47 = arith.cmpi eq, %46, %1 : vector<64x128xi32>
    %cst_13 = arith.constant 6.000000e-01 : f32
    %cst_14 = arith.constant 0.000000e+00 : f32
    %48 = vector.broadcast %cst_13 : f32 to vector<64x128xf32>
    %49 = vector.broadcast %cst_14 : f32 to vector<64x128xf32>
    %50 = arith.select %47, %48, %49 : vector<64x128xi1>, vector<64x128xf32>
    %51 = arith.addf %44, %50 : vector<64x128xf32>
    %52 = vector.extract_strided_slice %0 {offsets = [0, 7], sizes = [64, 1], strides = [1, 1]} : vector<64x20xi32> to vector<64x1xi32>
    %53 = vector.broadcast %52 : vector<64x1xi32> to vector<64x128xi32>
    %54 = arith.cmpi eq, %53, %1 : vector<64x128xi32>
    %cst_15 = arith.constant 4.000000e-01 : f32
    %cst_16 = arith.constant 0.000000e+00 : f32
    %55 = vector.broadcast %cst_15 : f32 to vector<64x128xf32>
    %56 = vector.broadcast %cst_16 : f32 to vector<64x128xf32>
    %57 = arith.select %54, %55, %56 : vector<64x128xi1>, vector<64x128xf32>
    %58 = arith.addf %51, %57 : vector<64x128xf32>
    %59 = vector.extract_strided_slice %0 {offsets = [0, 8], sizes = [64, 1], strides = [1, 1]} : vector<64x20xi32> to vector<64x1xi32>
    %60 = vector.broadcast %59 : vector<64x1xi32> to vector<64x128xi32>
    %61 = arith.cmpi eq, %60, %1 : vector<64x128xi32>
    %cst_17 = arith.constant 2.500000e-01 : f32
    %cst_18 = arith.constant 0.000000e+00 : f32
    %62 = vector.broadcast %cst_17 : f32 to vector<64x128xf32>
    %63 = vector.broadcast %cst_18 : f32 to vector<64x128xf32>
    %64 = arith.select %61, %62, %63 : vector<64x128xi1>, vector<64x128xf32>
    %65 = arith.addf %58, %64 : vector<64x128xf32>
    %66 = vector.extract_strided_slice %0 {offsets = [0, 9], sizes = [64, 1], strides = [1, 1]} : vector<64x20xi32> to vector<64x1xi32>
    %67 = vector.broadcast %66 : vector<64x1xi32> to vector<64x128xi32>
    %68 = arith.cmpi eq, %67, %1 : vector<64x128xi32>
    %cst_19 = arith.constant 1.000000e-01 : f32
    %cst_20 = arith.constant 0.000000e+00 : f32
    %69 = vector.broadcast %cst_19 : f32 to vector<64x128xf32>
    %70 = vector.broadcast %cst_20 : f32 to vector<64x128xf32>
    %71 = arith.select %68, %69, %70 : vector<64x128xi1>, vector<64x128xf32>
    %72 = arith.addf %65, %71 : vector<64x128xf32>
    %73 = vector.extract_strided_slice %0 {offsets = [0, 10], sizes = [64, 1], strides = [1, 1]} : vector<64x20xi32> to vector<64x1xi32>
    %74 = vector.broadcast %73 : vector<64x1xi32> to vector<64x128xi32>
    %75 = arith.cmpi eq, %74, %1 : vector<64x128xi32>
    %cst_21 = arith.constant 1.000000e+00 : f32
    %cst_22 = arith.constant 0.000000e+00 : f32
    %76 = vector.broadcast %cst_21 : f32 to vector<64x128xf32>
    %77 = vector.broadcast %cst_22 : f32 to vector<64x128xf32>
    %78 = arith.select %75, %76, %77 : vector<64x128xi1>, vector<64x128xf32>
    %79 = arith.addf %72, %78 : vector<64x128xf32>
    %80 = vector.extract_strided_slice %0 {offsets = [0, 11], sizes = [64, 1], strides = [1, 1]} : vector<64x20xi32> to vector<64x1xi32>
    %81 = vector.broadcast %80 : vector<64x1xi32> to vector<64x128xi32>
    %82 = arith.cmpi eq, %81, %1 : vector<64x128xi32>
    %cst_23 = arith.constant 6.000000e-01 : f32
    %cst_24 = arith.constant 0.000000e+00 : f32
    %83 = vector.broadcast %cst_23 : f32 to vector<64x128xf32>
    %84 = vector.broadcast %cst_24 : f32 to vector<64x128xf32>
    %85 = arith.select %82, %83, %84 : vector<64x128xi1>, vector<64x128xf32>
    %86 = arith.addf %79, %85 : vector<64x128xf32>
    %87 = vector.extract_strided_slice %0 {offsets = [0, 12], sizes = [64, 1], strides = [1, 1]} : vector<64x20xi32> to vector<64x1xi32>
    %88 = vector.broadcast %87 : vector<64x1xi32> to vector<64x128xi32>
    %89 = arith.cmpi eq, %88, %1 : vector<64x128xi32>
    %cst_25 = arith.constant 4.000000e-01 : f32
    %cst_26 = arith.constant 0.000000e+00 : f32
    %90 = vector.broadcast %cst_25 : f32 to vector<64x128xf32>
    %91 = vector.broadcast %cst_26 : f32 to vector<64x128xf32>
    %92 = arith.select %89, %90, %91 : vector<64x128xi1>, vector<64x128xf32>
    %93 = arith.addf %86, %92 : vector<64x128xf32>
    %94 = vector.extract_strided_slice %0 {offsets = [0, 13], sizes = [64, 1], strides = [1, 1]} : vector<64x20xi32> to vector<64x1xi32>
    %95 = vector.broadcast %94 : vector<64x1xi32> to vector<64x128xi32>
    %96 = arith.cmpi eq, %95, %1 : vector<64x128xi32>
    %cst_27 = arith.constant 2.500000e-01 : f32
    %cst_28 = arith.constant 0.000000e+00 : f32
    %97 = vector.broadcast %cst_27 : f32 to vector<64x128xf32>
    %98 = vector.broadcast %cst_28 : f32 to vector<64x128xf32>
    %99 = arith.select %96, %97, %98 : vector<64x128xi1>, vector<64x128xf32>
    %100 = arith.addf %93, %99 : vector<64x128xf32>
    %101 = vector.extract_strided_slice %0 {offsets = [0, 14], sizes = [64, 1], strides = [1, 1]} : vector<64x20xi32> to vector<64x1xi32>
    %102 = vector.broadcast %101 : vector<64x1xi32> to vector<64x128xi32>
    %103 = arith.cmpi eq, %102, %1 : vector<64x128xi32>
    %cst_29 = arith.constant 1.000000e-01 : f32
    %cst_30 = arith.constant 0.000000e+00 : f32
    %104 = vector.broadcast %cst_29 : f32 to vector<64x128xf32>
    %105 = vector.broadcast %cst_30 : f32 to vector<64x128xf32>
    %106 = arith.select %103, %104, %105 : vector<64x128xi1>, vector<64x128xf32>
    %107 = arith.addf %100, %106 : vector<64x128xf32>
    %108 = vector.extract_strided_slice %0 {offsets = [0, 15], sizes = [64, 1], strides = [1, 1]} : vector<64x20xi32> to vector<64x1xi32>
    %109 = vector.broadcast %108 : vector<64x1xi32> to vector<64x128xi32>
    %110 = arith.cmpi eq, %109, %1 : vector<64x128xi32>
    %cst_31 = arith.constant 1.000000e+00 : f32
    %cst_32 = arith.constant 0.000000e+00 : f32
    %111 = vector.broadcast %cst_31 : f32 to vector<64x128xf32>
    %112 = vector.broadcast %cst_32 : f32 to vector<64x128xf32>
    %113 = arith.select %110, %111, %112 : vector<64x128xi1>, vector<64x128xf32>
    %114 = arith.addf %107, %113 : vector<64x128xf32>
    %115 = vector.extract_strided_slice %0 {offsets = [0, 16], sizes = [64, 1], strides = [1, 1]} : vector<64x20xi32> to vector<64x1xi32>
    %116 = vector.broadcast %115 : vector<64x1xi32> to vector<64x128xi32>
    %117 = arith.cmpi eq, %116, %1 : vector<64x128xi32>
    %cst_33 = arith.constant 6.000000e-01 : f32
    %cst_34 = arith.constant 0.000000e+00 : f32
    %118 = vector.broadcast %cst_33 : f32 to vector<64x128xf32>
    %119 = vector.broadcast %cst_34 : f32 to vector<64x128xf32>
    %120 = arith.select %117, %118, %119 : vector<64x128xi1>, vector<64x128xf32>
    %121 = arith.addf %114, %120 : vector<64x128xf32>
    %122 = vector.extract_strided_slice %0 {offsets = [0, 17], sizes = [64, 1], strides = [1, 1]} : vector<64x20xi32> to vector<64x1xi32>
    %123 = vector.broadcast %122 : vector<64x1xi32> to vector<64x128xi32>
    %124 = arith.cmpi eq, %123, %1 : vector<64x128xi32>
    %cst_35 = arith.constant 4.000000e-01 : f32
    %cst_36 = arith.constant 0.000000e+00 : f32
    %125 = vector.broadcast %cst_35 : f32 to vector<64x128xf32>
    %126 = vector.broadcast %cst_36 : f32 to vector<64x128xf32>
    %127 = arith.select %124, %125, %126 : vector<64x128xi1>, vector<64x128xf32>
    %128 = arith.addf %121, %127 : vector<64x128xf32>
    %129 = vector.extract_strided_slice %0 {offsets = [0, 18], sizes = [64, 1], strides = [1, 1]} : vector<64x20xi32> to vector<64x1xi32>
    %130 = vector.broadcast %129 : vector<64x1xi32> to vector<64x128xi32>
    %131 = arith.cmpi eq, %130, %1 : vector<64x128xi32>
    %cst_37 = arith.constant 2.500000e-01 : f32
    %cst_38 = arith.constant 0.000000e+00 : f32
    %132 = vector.broadcast %cst_37 : f32 to vector<64x128xf32>
    %133 = vector.broadcast %cst_38 : f32 to vector<64x128xf32>
    %134 = arith.select %131, %132, %133 : vector<64x128xi1>, vector<64x128xf32>
    %135 = arith.addf %128, %134 : vector<64x128xf32>
    %136 = vector.extract_strided_slice %0 {offsets = [0, 19], sizes = [64, 1], strides = [1, 1]} : vector<64x20xi32> to vector<64x1xi32>
    %137 = vector.broadcast %136 : vector<64x1xi32> to vector<64x128xi32>
    %138 = arith.cmpi eq, %137, %1 : vector<64x128xi32>
    %cst_39 = arith.constant 1.000000e-01 : f32
    %cst_40 = arith.constant 0.000000e+00 : f32
    %139 = vector.broadcast %cst_39 : f32 to vector<64x128xf32>
    %140 = vector.broadcast %cst_40 : f32 to vector<64x128xf32>
    %141 = arith.select %138, %139, %140 : vector<64x128xi1>, vector<64x128xf32>
    %142 = arith.addf %135, %141 : vector<64x128xf32>
    %c0_41 = arith.constant 0 : index
    %c0_42 = arith.constant 0 : index
    %143 = vector.load %arg2[%c0_41, %c0_42] : memref<128x128xf32, #tpu.memory_space<vmem>>, vector<128x128xf32>
    %cst_43 = arith.constant dense<0.000000e+00> : vector<64x128xf32>
    %144 = tpu.matmul %142, %143, %cst_43 {dimension_numbers = #tpu.dot_dimension_numbers<[1], [0], [0], [1], [0, 0, 1, 1], [], []>} : vector<64x128xf32>, vector<128x128xf32>, vector<64x128xf32> -> vector<64x128xf32>
    %c0_44 = arith.constant 0 : index
    %c0_45 = arith.constant 0 : index
    %145 = vector.load %arg3[%c0_44, %c0_45] : memref<64x128xf32, #tpu.memory_space<vmem>>, vector<64x128xf32>
    tpu.vector_store %arg3[%c0_44, %c0_45], %144 {strides = array<i32>} : memref<64x128xf32, #tpu.memory_space<vmem>>, vector<64x128xf32>,
    return
  }
  func.func @transform_0(%arg0: i32) -> (i32, i32) {
    %c0_i32 = arith.constant 0 : i32
    %c0_i32_0 = arith.constant 0 : i32
    return %arg0, %c0_i32 : i32, i32
  }
  func.func @transform_1(%arg0: i32) -> (i32, i32) {
    %c0_i32 = arith.constant 0 : i32
    %c0_i32_0 = arith.constant 0 : i32
    %c0_i32_1 = arith.constant 0 : i32
    return %c0_i32, %c0_i32_0 : i32, i32
  }
  func.func @transform_2(%arg0: i32) -> (i32, i32) {
    %c0_i32 = arith.constant 0 : i32
    %c0_i32_0 = arith.constant 0 : i32
    return %arg0, %c0_i32 : i32, i32
  }
}

</mosaic_0001>

<bundles_post_ra>
// kernel: _forward_impl.1
= control target key start
LH: loop header
LB: loop body
LE: loop exit
PB: predicated region body
PF: predicated region fallthrough
CT: control target
= control target key end

     0   :  { %v1201_v0 = vmov 0   ;;  %v1202_v9 = vmov 1   ;;  %v1203_v10 = vmov 2   ;;  %v1204_v11 = vmov 3   ;;  %s2086_s0 = inlined_call_operand.vmem [shape: s32[64,20], index: 0, kind: input, shape index: {}]   ;;  %s2087_s1 = inlined_call_operand.vmem [shape: f32[128,128], index: 1, kind: input, shape index: {}]   ;;  %s2088_s2 = inlined_call_operand.vmem [shape: f32[64,128], index: 2, kind: output, shape index: {}]  }
   0x1   :  { %1121 = vset.pattern.permute.xlu2 %v1201_v0  ;;  %1120 = vset.pattern.permute.xlu1 %v1201_v0  ;;  %v1240_v1 = vld [vmem:[%s2086_s0 + $0x20] sm:$0xff]  ;;  %v1245_v2 = vld [vmem:[%s2086_s0 + $0x10] sm:$0xff]  ;;  %v1258_v4 = vld [vmem:[%s2086_s0 + $0x28] sm:$0xff]  ;;  %v1205_v12 = vmov 4   ;;  %v1206_v14 = vmov 5   ;;  %v1207_v17 = vmov 6   ;;  %v19_v27 = vlaneseq }
   0x2   :  { %v1250_v3 = vld [vmem:[%s2086_s0] sm:$0xff]  ;;  %1119 = vset.pattern.permute.xlu0 %v1201_v0  ;;  %34 = vperm.xlu2 %1121, %v1240_v1   ;;  %v1263_v5 = vld [vmem:[%s2086_s0 + $0x18] sm:$0xff]  ;;  %v1268_v6 = vld [vmem:[%s2086_s0 + $0x8] sm:$0xff]  ;;  %v1208_v24 = vmov 7   ;;  %v1209_v31 = vmov 0.0   ;;  %v1210_v37 = vmov 8  }
   0x3   :  { %28 = vperm.xlu1 %1120, %v1245_v2   ;;  %22 = vperm.xlu0 %1119, %v1250_v3   ;;  %v1276_v7 = vld [vmem:[%s2086_s0 + $0x38] sm:$0xff]  ;;  %v1281_v8 = vld [vmem:[%s2086_s0 + $0x30] sm:$0xff]  ;;  %v1348_v29 = vand.u32 127, %v19_v27  ;;  %v1211_v49 = vmov 9   ;;  %v1212_v0 = vmov 10  }
   0xa   :  { %37 = vperm.xlu2 %1121, %v1258_v4  }
   0xb   :  { %31 = vperm.xlu1 %1120, %v1263_v5   ;;  %25 = vperm.xlu0 %1119, %v1268_v6  }
  0x12   :  { %1122 = vset.pattern.permute.xlu2 %v1202_v9 }
  0x13   :  { %43 = vperm.xlu1 %1120, %v1276_v7   ;;  %40 = vperm.xlu0 %1119, %v1281_v8  }
  0x14   :  { %70 = vperm.xlu2 %1122, %v1250_v3  }
  0x1b   :  { %1124 = vset.pattern.permute.xlu1 %v1202_v9  ;;  %1123 = vset.pattern.permute.xlu0 %v1202_v9 }
  0x1c   :  { %76 = vperm.xlu1 %1124, %v1245_v2   ;;  %79 = vperm.xlu2 %1122, %v1263_v5  }
  0x1d   :  { %73 = vperm.xlu0 %1123, %v1268_v6  }
  0x24   :  { %82 = vperm.xlu1 %1124, %v1240_v1   ;;  %85 = vperm.xlu2 %1122, %v1258_v4  }
  0x25   :  { %88 = vperm.xlu0 %1123, %v1281_v8  }
  0x2c   :  { %91 = vperm.xlu1 %1124, %v1276_v7   ;;  %1125 = vset.pattern.permute.xlu2 %v1203_v10 }
  0x2d   :  { %1126 = vset.pattern.permute.xlu0 %v1203_v10  ;;  %118 = vperm.xlu2 %1125, %v1250_v3  }
  0x2e   :  { %121 = vperm.xlu0 %1126, %v1268_v6  }
  0x34   :  { %1127 = vset.pattern.permute.xlu1 %v1203_v10 }
  0x35   :  { %124 = vperm.xlu1 %1127, %v1245_v2   ;;  %127 = vperm.xlu2 %1125, %v1263_v5  }
  0x36   :  { %136 = vperm.xlu0 %1126, %v1281_v8  }
  0x3d   :  { %130 = vperm.xlu1 %1127, %v1240_v1   ;;  %133 = vperm.xlu2 %1125, %v1258_v4  }
  0x3e   :  { %1129 = vset.pattern.permute.xlu0 %v1204_v11 }
  0x3f   :  { %169 = vperm.xlu0 %1129, %v1268_v6  }
  0x45   :  { %139 = vperm.xlu1 %1127, %v1276_v7   ;;  %1128 = vset.pattern.permute.xlu2 %v1204_v11 }
  0x46   :  { %166 = vperm.xlu2 %1128, %v1250_v3  }
  0x47   :  { %184 = vperm.xlu0 %1129, %v1281_v8  }
  0x4d   :  { %1130 = vset.pattern.permute.xlu1 %v1204_v11 }
  0x4e   :  { %172 = vperm.xlu1 %1130, %v1245_v2   ;;  %175 = vperm.xlu2 %1128, %v1263_v5  }
  0x4f   :  { %1132 = vset.pattern.permute.xlu0 %v1205_v12 }
  0x50   :  { %217 = vperm.xlu0 %1132, %v1268_v6  }
  0x56   :  { %178 = vperm.xlu1 %1130, %v1240_v1   ;;  %181 = vperm.xlu2 %1128, %v1258_v4  }
  0x58   :  { %232 = vperm.xlu0 %1132, %v1281_v8  }
  0x5c   :  { %v1310_v13 = vpop.permute.xlu2 %34 }
  0x5e   :  { %187 = vperm.xlu1 %1130, %v1276_v7   ;;  %1131 = vset.pattern.permute.xlu2 %v1205_v12 }
  0x5f   :  { %214 = vperm.xlu2 %1131, %v1250_v3  }
  0x60   :  { %1135 = vset.pattern.permute.xlu0 %v1206_v14 }
  0x61   :  { %265 = vperm.xlu0 %1135, %v1268_v6  }
  0x64   :  { %v1315_v15 = vpop.permute.xlu2 %37 }
  0x66   :  { %1133 = vset.pattern.permute.xlu1 %v1205_v12 }
  0x67   :  { %220 = vperm.xlu1 %1133, %v1245_v2   ;;  %223 = vperm.xlu2 %1131, %v1263_v5  }
  0x69   :  { %280 = vperm.xlu0 %1135, %v1281_v8  }
  0x6e   :  { %v1320_v16 = vpop.permute.xlu2 %70 }
  0x6f   :  { %226 = vperm.xlu1 %1133, %v1240_v1   ;;  %229 = vperm.xlu2 %1131, %v1258_v4   ;;  %vm93_vm6 = vcmp.eq.s32.totalorder %v1320_v16, %v1348_v29 }
  0x70   :  { %v101_v57 = vsel %vm93_vm6, 0.6, %v1209_v31 }
  0x71   :  { %1138 = vset.pattern.permute.xlu0 %v1207_v17 }
  0x72   :  { %313 = vperm.xlu0 %1138, %v1268_v6  }
  0x75   :  { %v1325_v18 = vpop.permute.xlu1 %28  ;;  %v1327_v19 = vpop.permute.xlu0 %22 }
  0x76   :  { %v1329_v20 = vpop.permute.xlu2 %79  ;;  %vm45_vm7 = vcmp.eq.s32.totalorder %v1327_v19, %v1348_v29 }
  0x77   :  { %235 = vperm.xlu1 %1133, %v1276_v7   ;;  %1134 = vset.pattern.permute.xlu2 %v1206_v14  ;;  %v53_v58 = vsel %vm45_vm7, 1.0, %v1209_v31  ;;  %vm96_vm15 = vcmp.eq.s32.totalorder %v1329_v20, %v1348_v29  ;;  %vm50_vm7 = vcmp.eq.s32.totalorder %v1315_v15, %v1348_v29 }
  0x78   :  { %262 = vperm.xlu2 %1134, %v1250_v3   ;;  %v109_v61 = vadd.f32 %v101_v57, %v53_v58  ;;  %v1214_v58 = vmov 12  }
  0x7a   :  { %328 = vperm.xlu0 %1138, %v1281_v8  }
  0x7d   :  { %v1334_v21 = vpop.permute.xlu1 %31  ;;  %v26_v22 = vpop.permute.xlu0 %25 }
  0x7e   :  { %v1336_v23 = vpop.permute.xlu2 %85  ;;  %vm46_vm0 = vcmp.eq.s32.totalorder %v26_v22, %v1348_v29 }
  0x7f   :  { %1136 = vset.pattern.permute.xlu1 %v1206_v14  ;;  %v54_v32 = vsel %vm46_vm0, 1.0, %v1209_v31  ;;  %vm48_vm0 = vcmp.eq.s32.totalorder %v1334_v21, %v1348_v29  ;;  %vm98_vm6 = vcmp.eq.s32.totalorder %v1336_v23, %v1348_v29 }
  0x80   :  { %268 = vperm.xlu1 %1136, %v1245_v2   ;;  %271 = vperm.xlu2 %1134, %v1263_v5  }
  0x82   :  { %1141 = vset.pattern.permute.xlu0 %v1208_v24 }
  0x83   :  { %361 = vperm.xlu0 %1141, %v1268_v6  }
  0x85   :  { %v1342_v25 = vpop.permute.xlu1 %43  ;;  %v41_v26 = vpop.permute.xlu0 %40 }
  0x86   :  { %vm51_vm2 = vcmp.eq.s32.totalorder %v41_v26, %v1348_v29 }
  0x87   :  { %v1344_v28 = vpop.permute.xlu2 %118  ;;  %v59_v39 = vsel %vm51_vm2, 1.0, %v1209_v31 }
  0x88   :  { %274 = vperm.xlu1 %1136, %v1240_v1   ;;  %277 = vperm.xlu2 %1134, %v1258_v4   ;;  %vm141_vm8 = vcmp.eq.s32.totalorder %v1344_v28, %v1348_v29 }
  0x89   :  { %v149_v63 = vsel %vm141_vm8, 0.4, %v1209_v31 }
  0x8a   :  { %v157_v11 = vadd.f32 %v149_v63, %v109_v61 }
  0x8b   :  { %376 = vperm.xlu0 %1141, %v1281_v8  }
  0x8e   :  { %v1352_v30 = vpop.permute.xlu1 %76 }
  0x8f   :  { %v1355_v33 = vpop.permute.xlu2 %127  ;;  %v74_v34 = vpop.permute.xlu0 %73 }
  0x90   :  { %283 = vperm.xlu1 %1136, %v1276_v7   ;;  %1137 = vset.pattern.permute.xlu2 %v1207_v17  ;;  %vm94_vm1 = vcmp.eq.s32.totalorder %v74_v34, %v1348_v29 }
  0x91   :  { %310 = vperm.xlu2 %1137, %v1250_v3   ;;  %v102_v35 = vsel %vm94_vm1, 0.6, %v1209_v31  ;;  %vm144_vm1 = vcmp.eq.s32.totalorder %v1355_v33, %v1348_v29 }
  0x92   :  { %v110_v36 = vadd.f32 %v102_v35, %v54_v32  ;;  %v1213_v35 = vmov 11   ;;  %v152_v21 = vsel %vm144_vm1, 0.4, %v1209_v31 }
  0x93   :  { %1144 = vset.pattern.permute.xlu0 %v1210_v37 }
  0x94   :  { %409 = vperm.xlu0 %1144, %v1268_v6  }
  0x96   :  { %v1364_v38 = vpop.permute.xlu1 %82 }
  0x97   :  { %v1367_v40 = vpop.permute.xlu2 %133  ;;  %v89_v41 = vpop.permute.xlu0 %88 }
  0x98   :  { %1139 = vset.pattern.permute.xlu1 %v1207_v17  ;;  %vm99_vm3 = vcmp.eq.s32.totalorder %v89_v41, %v1348_v29  ;;  %vm146_vm8 = vcmp.eq.s32.totalorder %v1367_v40, %v1348_v29 }
  0x99   :  { %316 = vperm.xlu1 %1139, %v1245_v2   ;;  %319 = vperm.xlu2 %1137, %v1263_v5   ;;  %v107_v42 = vsel %vm99_vm3, 0.6, %v1209_v31  ;;  %v154_v40 = vsel %vm146_vm8, 0.4, %v1209_v31 }
  0x9a   :  { %v115_v43 = vadd.f32 %v107_v42, %v59_v39 }
  0x9c   :  { %424 = vperm.xlu0 %1144, %v1281_v8  }
  0x9e   :  { %v1374_v44 = vpop.permute.xlu1 %91 }
  0xa0   :  { %v167_v45 = vpop.permute.xlu2 %166  ;;  %v122_v46 = vpop.permute.xlu0 %121 }
  0xa1   :  { %322 = vperm.xlu1 %1139, %v1240_v1   ;;  %325 = vperm.xlu2 %1137, %v1258_v4   ;;  %vm142_vm4 = vcmp.eq.s32.totalorder %v122_v46, %v1348_v29  ;;  %vm189_vm10 = vcmp.eq.s32.totalorder %v167_v45, %v1348_v29  ;;  %v56_v46 = vsel %vm48_vm0, 1.0, %v1209_v31 }
  0xa2   :  { %v150_v47 = vsel %vm142_vm4, 0.4, %v1209_v31  ;;  %v197_v9 = vsel %vm189_vm10, 0.25, %v1209_v31 }
  0xa3   :  { %v158_v48 = vadd.f32 %v150_v47, %v110_v36  ;;  %v205_v16 = vadd.f32 %v197_v9, %v157_v11  ;;  %v58_v9 = vsel %vm50_vm7, 1.0, %v1209_v31 }
  0xa4   :  { %1147 = vset.pattern.permute.xlu0 %v1211_v49 }
  0xa5   :  { %457 = vperm.xlu0 %1147, %v1268_v6  }
  0xa7   :  { %v1382_v50 = vpop.permute.xlu1 %124 }
  0xa8   :  { %v1384_v51 = vpop.permute.xlu2 %175  ;;  %v137_v52 = vpop.permute.xlu0 %136 }
  0xa9   :  { %331 = vperm.xlu1 %1139, %v1276_v7   ;;  %1140 = vset.pattern.permute.xlu2 %v1208_v24  ;;  %vm147_vm5 = vcmp.eq.s32.totalorder %v137_v52, %v1348_v29  ;;  %vm192_vm2 = vcmp.eq.s32.totalorder %v1384_v51, %v1348_v29 }
  0xaa   :  { %358 = vperm.xlu2 %1140, %v1250_v3   ;;  %v155_v53 = vsel %vm147_vm5, 0.4, %v1209_v31 }
  0xab   :  { %v163_v54 = vadd.f32 %v155_v53, %v115_v43  ;;  %v200_v53 = vsel %vm192_vm2, 0.25, %v1209_v31 }
  0xad   :  { %472 = vperm.xlu0 %1147, %v1281_v8  }
  0xaf   :  { %v1396_v55 = vpop.permute.xlu1 %130 }
  0xb0   :  { %v1398_v56 = vpop.permute.xlu2 %181 }
  0xb1   :  { %1142 = vset.pattern.permute.xlu1 %v1208_v24  ;;  %v170_v59 = vpop.permute.xlu0 %169 }
  0xb2   :  { %364 = vperm.xlu1 %1142, %v1245_v2   ;;  %367 = vperm.xlu2 %1140, %v1263_v5   ;;  %vm190_vm9 = vcmp.eq.s32.totalorder %v170_v59, %v1348_v29 }
  0xb3   :  { %v198_v60 = vsel %vm190_vm9, 0.25, %v1209_v31  ;;  %vm194_vm9 = vcmp.eq.s32.totalorder %v1398_v56, %v1348_v29 }
  0xb4   :  { %v206_v62 = vadd.f32 %v198_v60, %v158_v48 }
  0xb5   :  { %1150 = vset.pattern.permute.xlu0 %v1212_v0 }
  0xb6   :  { %505 = vperm.xlu0 %1150, %v1268_v6  }
  0xb7   :  { %v1414_v10 = vpop.permute.xlu1 %139 }
  0xb9   :  { %v215_v12 = vpop.permute.xlu2 %214  ;;  %v185_v14 = vpop.permute.xlu0 %184 }
  0xba   :  { %vm237_vm11 = vcmp.eq.s32.totalorder %v215_v12, %v1348_v29  ;;  %370 = vperm.xlu1 %1142, %v1240_v1   ;;  %373 = vperm.xlu2 %1140, %v1258_v4   ;;  %vm195_vm12 = vcmp.eq.s32.totalorder %v185_v14, %v1348_v29 }
  0xbb   :  { %v245_v17 = vsel %vm237_vm11, 0.1, %v1209_v31  ;;  %v203_v19 = vsel %vm195_vm12, 0.25, %v1209_v31 }
  0xbc   :  { %v253_v22 = vadd.f32 %v245_v17, %v205_v16  ;;  %v211_v24 = vadd.f32 %v203_v19, %v163_v54  ;;  %v202_v16 = vsel %vm194_vm9, 0.25, %v1209_v31 }
  0xbe   :  { %520 = vperm.xlu0 %1150, %v1281_v8  }
  0xc0   :  { %v1423_v26 = vpop.permute.xlu1 %172 }
  0xc1   :  { %v224_v27 = vpop.permute.xlu2 %223  ;;  %vm191_vm7 = vcmp.eq.s32.totalorder %v1423_v26, %v1348_v29 }
  0xc2   :  { %379 = vperm.xlu1 %1142, %v1276_v7   ;;  %1143 = vset.pattern.permute.xlu2 %v1210_v37  ;;  %v218_v28 = vpop.permute.xlu0 %217  ;;  %vm240_vm5 = vcmp.eq.s32.totalorder %v224_v27, %v1348_v29 }
  0xc3   :  { %406 = vperm.xlu2 %1143, %v1250_v3   ;;  %vm238_vm13 = vcmp.eq.s32.totalorder %v218_v28, %v1348_v29  ;;  %v248_v59 = vsel %vm240_vm5, 0.1, %v1209_v31  ;;  %vm143_vm5 = vcmp.eq.s32.totalorder %v1382_v50, %v1348_v29 }
  0xc4   :  { %v246_v32 = vsel %vm238_vm13, 0.1, %v1209_v31  ;;  %vm100_vm13 = vcmp.eq.s32.totalorder %v1374_v44, %v1348_v29 }
  0xc5   :  { %v254_v34 = vadd.f32 %v246_v32, %v206_v62  ;;  %v106_v62 = vsel %vm98_vm6, 0.6, %v1209_v31  ;;  %v108_v32 = vsel %vm100_vm13, 0.6, %v1209_v31  ;;  %vm145_vm13 = vcmp.eq.s32.totalorder %v1396_v55, %v1348_v29 }
  0xc6   :  { %1153 = vset.pattern.permute.xlu0 %v1213_v35  ;;  %v114_v12 = vadd.f32 %v106_v62, %v58_v9 }
  0xc7   :  { %553 = vperm.xlu0 %1153, %v1268_v6  }
  0xc8   :  { %v1432_v36 = vpop.permute.xlu1 %178  ;;  %v162_v19 = vadd.f32 %v154_v40, %v114_v12 }
  0xc9   :  { %v230_v39 = vpop.permute.xlu2 %229 }
  0xca   :  { %1145 = vset.pattern.permute.xlu1 %v1210_v37  ;;  %v233_v41 = vpop.permute.xlu0 %232  ;;  %v104_v37 = vsel %vm96_vm15, 0.6, %v1209_v31  ;;  %vm242_vm12 = vcmp.eq.s32.totalorder %v230_v39, %v1348_v29  ;;  %vm148_vm15 = vcmp.eq.s32.totalorder %v1414_v10, %v1348_v29 }
  0xcb   :  { %412 = vperm.xlu1 %1145, %v1245_v2   ;;  %415 = vperm.xlu2 %1143, %v1263_v5   ;;  %vm243_vm14 = vcmp.eq.s32.totalorder %v233_v41, %v1348_v29  ;;  %v112_v33 = vadd.f32 %v104_v37, %v56_v46  ;;  %v156_v39 = vsel %vm148_vm15, 0.4, %v1209_v31  ;;  %v1215_v46 = vmov 13  }
  0xcc   :  { %v251_v42 = vsel %vm243_vm14, 0.1, %v1209_v31  ;;  %vm52_vm14 = vcmp.eq.s32.totalorder %v1342_v25, %v1348_v29 }
  0xcd   :  { %v259_v43 = vadd.f32 %v251_v42, %v211_v24  ;;  %v160_v57 = vadd.f32 %v152_v21, %v112_v33  ;;  %v210_v24 = vadd.f32 %v202_v16, %v162_v19  ;;  %v60_v44 = vsel %vm52_vm14, 1.0, %v1209_v31 }
  0xce   :  { %v116_v42 = vadd.f32 %v108_v32, %v60_v44  ;;  %vm193_vm14 = vcmp.eq.s32.totalorder %v1432_v36, %v1348_v29  ;;  %v1216_v32 = vmov 14  }
  0xcf   :  { %568 = vperm.xlu0 %1153, %v1281_v8   ;;  %v208_v60 = vadd.f32 %v200_v53, %v160_v57  ;;  %v201_v16 = vsel %vm193_vm14, 0.25, %v1209_v31 }
  0xd0   :  { %v1444_v45 = vpop.permute.xlu1 %187  ;;  %v164_v37 = vadd.f32 %v156_v39, %v116_v42 }
  0xd1   :  { %v256_v63 = vadd.f32 %v248_v59, %v208_v60  ;;  %vm196_vm1 = vcmp.eq.s32.totalorder %v1444_v45, %v1348_v29 }
  0xd2   :  { %v263_v47 = vpop.permute.xlu2 %262 }
  0xd3   :  { %vm285_vm3 = vcmp.eq.s32.totalorder %v263_v47, %v1348_v29  ;;  %418 = vperm.xlu1 %1145, %v1240_v1   ;;  %421 = vperm.xlu2 %1143, %v1258_v4   ;;  %v266_v20 = vpop.permute.xlu0 %265 }
  0xd4   :  { %v293_v48 = vsel %vm285_vm3, 1.0, %v1209_v31  ;;  %vm286_vm4 = vcmp.eq.s32.totalorder %v266_v20, %v1348_v29  ;;  %vm95_vm3 = vcmp.eq.s32.totalorder %v1352_v30, %v1348_v29 }
  0xd5   :  { %v1459_v52 = vadd.f32 %v293_v48, %v253_v22  ;;  %v294_v51 = vsel %vm286_vm4, 1.0, %v1209_v31  ;;  %v250_v22 = vsel %vm242_vm12, 0.1, %v1209_v31  ;;  %vm47_vm4 = vcmp.eq.s32.totalorder %v1325_v18, %v1348_v29 }
  0xd6   :  { %v302_v54 = vadd.f32 %v294_v51, %v254_v34  ;;  %v258_v34 = vadd.f32 %v250_v22, %v210_v24  ;;  %v103_v20 = vsel %vm95_vm3, 0.6, %v1209_v31  ;;  %v55_v33 = vsel %vm47_vm4, 1.0, %v1209_v31 }
  0xd7   :  { %1156 = vset.pattern.permute.xlu0 %v1214_v58  ;;  %v151_v18 = vsel %vm143_vm5, 0.4, %v1209_v31  ;;  %v111_v53 = vadd.f32 %v103_v20, %v55_v33  ;;  %vm49_vm12 = vcmp.eq.s32.totalorder %v1310_v13, %v1348_v29  ;;  %v153_v13 = vsel %vm145_vm13, 0.4, %v1209_v31 }
  0xd8   :  { %601 = vperm.xlu0 %1156, %v1268_v6   ;;  %v57_v9 = vsel %vm49_vm12, 1.0, %v1209_v31  ;;  %v1217_v33 = vmov 15  }
  0xd9   :  { %v1472_v61 = vpop.permute.xlu1 %220  ;;  %v159_v60 = vadd.f32 %v151_v18, %v111_v53 }
  0xda   :  { %v272_v23 = vpop.permute.xlu2 %271  ;;  %vm239_vm9 = vcmp.eq.s32.totalorder %v1472_v61, %v1348_v29 }
  0xdb   :  { %vm288_vm10 = vcmp.eq.s32.totalorder %v272_v23, %v1348_v29  ;;  %427 = vperm.xlu1 %1145, %v1276_v7   ;;  %1146 = vset.pattern.permute.xlu2 %v1211_v49  ;;  %v281_v15 = vpop.permute.xlu0 %280  ;;  %v247_v23 = vsel %vm239_vm9, 0.1, %v1209_v31 }
  0xdc   :  { %v296_v11 = vsel %vm288_vm10, 1.0, %v1209_v31  ;;  %454 = vperm.xlu2 %1146, %v1250_v3   ;;  %vm291_vm11 = vcmp.eq.s32.totalorder %v281_v15, %v1348_v29 }
  0xdd   :  { %v1486_v56 = vadd.f32 %v296_v11, %v256_v63  ;;  %v299_v14 = vsel %vm291_vm11, 1.0, %v1209_v31  ;;  %vm97_vm11 = vcmp.eq.s32.totalorder %v1364_v38, %v1348_v29 }
  0xde   :  { %v307_v17 = vadd.f32 %v299_v14, %v259_v43  ;;  %v204_v43 = vsel %vm196_vm1, 0.25, %v1209_v31 }
  0xdf   :  { %v212_v21 = vadd.f32 %v204_v43, %v164_v37 }
  0xe0   :  { %616 = vperm.xlu0 %1156, %v1281_v8  }
  0xe1   :  { %v1496_v27 = vpop.permute.xlu1 %226 }
  0xe2   :  { %v278_v28 = vpop.permute.xlu2 %277  ;;  %vm241_vm1 = vcmp.eq.s32.totalorder %v1496_v27, %v1348_v29 }
  0xe3   :  { %vm290_vm0 = vcmp.eq.s32.totalorder %v278_v28, %v1348_v29  ;;  %1148 = vset.pattern.permute.xlu1 %v1211_v49  ;;  %v249_v24 = vsel %vm241_vm1, 0.1, %v1209_v31 }
  0xe4   :  { %v298_v25 = vsel %vm290_vm0, 1.0, %v1209_v31  ;;  %460 = vperm.xlu1 %1148, %v1245_v2   ;;  %463 = vperm.xlu2 %1146, %v1263_v5   ;;  %v314_v10 = vpop.permute.xlu0 %313 }
  0xe5   :  { %v1510_v41 = vadd.f32 %v298_v25, %v258_v34  ;;  %vm334_vm2 = vcmp.eq.s32.totalorder %v314_v10, %v1348_v29 }
  0xe6   :  { %v342_v49 = vsel %vm334_vm2, 0.6, %v1209_v31 }
  0xe7   :  { %v350_v45 = vadd.f32 %v342_v49, %v302_v54  ;;  %v199_v54 = vsel %vm191_vm7, 0.25, %v1209_v31 }
  0xe8   :  { %1159 = vset.pattern.permute.xlu0 %v1215_v46  ;;  %v207_v61 = vadd.f32 %v199_v54, %v159_v60 }
  0xe9   :  { %649 = vperm.xlu0 %1159, %v1268_v6   ;;  %v236_v47 = vpop.permute.xlu1 %235 }
  0xea   :  { %vm244_vm6 = vcmp.eq.s32.totalorder %v236_v47, %v1348_v29  ;;  %v255_v38 = vadd.f32 %v247_v23, %v207_v61 }
  0xeb   :  { %v252_v30 = vsel %vm244_vm6, 0.1, %v1209_v31  ;;  %v311_v48 = vpop.permute.xlu2 %310 }
  0xec   :  { %v1530_v51 = vadd.f32 %v252_v30, %v212_v21  ;;  %vm333_vm8 = vcmp.eq.s32.totalorder %v311_v48, %v1348_v29  ;;  %466 = vperm.xlu1 %1148, %v1240_v1   ;;  %469 = vperm.xlu2 %1146, %v1258_v4   ;;  %v329_v50 = vpop.permute.xlu0 %328 }
  0xed   :  { %v341_v26 = vsel %vm333_vm8, 0.6, %v1209_v31  ;;  %vm339_vm10 = vcmp.eq.s32.totalorder %v329_v50, %v1348_v29 }
  0xee   :  { %v1541_v57 = vadd.f32 %v341_v26, %v1459_v52  ;;  %v347_v59 = vsel %vm339_vm10, 0.6, %v1209_v31  ;;  %v105_v52 = vsel %vm97_vm11, 0.6, %v1209_v31 }
  0xef   :  { %v355_v62 = vadd.f32 %v347_v59, %v307_v17  ;;  %v113_v55 = vadd.f32 %v105_v52, %v57_v9 }
  0xf1   :  { %664 = vperm.xlu0 %1159, %v1281_v8   ;;  %v161_v19 = vadd.f32 %v153_v13, %v113_v55 }
  0xf2   :  { %v269_v63 = vpop.permute.xlu1 %268 }
  0xf3   :  { %vm287_vm15 = vcmp.eq.s32.totalorder %v269_v63, %v1348_v29  ;;  %v320_v15 = vpop.permute.xlu2 %319  ;;  %v209_v28 = vadd.f32 %v201_v16, %v161_v19 }
  0xf4   :  { %v295_v40 = vsel %vm287_vm15, 1.0, %v1209_v31  ;;  %vm336_vm0 = vcmp.eq.s32.totalorder %v320_v15, %v1348_v29  ;;  %475 = vperm.xlu1 %1148, %v1276_v7   ;;  %1149 = vset.pattern.permute.xlu2 %v1212_v0 }
  0xf5   :  { %v303_v11 = vadd.f32 %v295_v40, %v255_v38  ;;  %v344_v12 = vsel %vm336_vm0, 0.6, %v1209_v31  ;;  %502 = vperm.xlu2 %1149, %v1250_v3   ;;  %v362_v14 = vpop.permute.xlu0 %361  ;;  %v257_v44 = vadd.f32 %v249_v24, %v209_v28 }
  0xf6   :  { %v352_v17 = vadd.f32 %v344_v12, %v1486_v56  ;;  %vm382_vm2 = vcmp.eq.s32.totalorder %v362_v14, %v1348_v29 }
  0xf7   :  { %v390_v22 = vsel %vm382_vm2, 0.4, %v1209_v31 }
  0xf8   :  { %v398_v27 = vadd.f32 %v390_v22, %v350_v45 }
  0xf9   :  { %1162 = vset.pattern.permute.xlu0 %v1216_v32 }
  0xfa   :  { %697 = vperm.xlu0 %1162, %v1268_v6   ;;  %v275_v34 = vpop.permute.xlu1 %274 }
  0xfb   :  { %vm289_vm3 = vcmp.eq.s32.totalorder %v275_v34, %v1348_v29  ;;  %v326_v36 = vpop.permute.xlu2 %325 }
  0xfc   :  { %v297_v56 = vsel %vm289_vm3, 1.0, %v1209_v31  ;;  %vm338_vm4 = vcmp.eq.s32.totalorder %v326_v36, %v1348_v29  ;;  %1151 = vset.pattern.permute.xlu1 %v1212_v0 }
  0xfd   :  { %v305_v25 = vadd.f32 %v297_v56, %v257_v44  ;;  %v346_v10 = vsel %vm338_vm4, 0.6, %v1209_v31  ;;  %508 = vperm.xlu1 %1151, %v1245_v2   ;;  %511 = vperm.xlu2 %1149, %v1263_v5   ;;  %v377_v39 = vpop.permute.xlu0 %376 }
  0xfe   :  { %v354_v42 = vadd.f32 %v346_v10, %v1510_v41  ;;  %vm387_vm5 = vcmp.eq.s32.totalorder %v377_v39, %v1348_v29 }
  0xff   :  { %v395_v49 = vsel %vm387_vm5, 0.4, %v1209_v31 }
 0x100   :  { %v403_v43 = vadd.f32 %v395_v49, %v355_v62 }
 0x102   :  { %712 = vperm.xlu0 %1162, %v1281_v8   ;;  %v284_v45 = vpop.permute.xlu1 %283 }
 0x103   :  { %vm292_vm6 = vcmp.eq.s32.totalorder %v284_v45, %v1348_v29 }
 0x104   :  { %v300_v0 = vsel %vm292_vm6, 1.0, %v1209_v31  ;;  %v359_v37 = vpop.permute.xlu2 %358 }
 0x105   :  { %v308_v47 = vadd.f32 %v300_v0, %v1530_v51  ;;  %vm381_vm7 = vcmp.eq.s32.totalorder %v359_v37, %v1348_v29  ;;  %514 = vperm.xlu1 %1151, %v1240_v1   ;;  %517 = vperm.xlu2 %1149, %v1258_v4  }
 0x106   :  { %v389_v41 = vsel %vm381_vm7, 0.4, %v1209_v31  ;;  %v410_v20 = vpop.permute.xlu0 %409 }
 0x107   :  { %v397_v21 = vadd.f32 %v389_v41, %v1541_v57  ;;  %vm430_vm8 = vcmp.eq.s32.totalorder %v410_v20, %v1348_v29 }
 0x108   :  { %v438_v30 = vsel %vm430_vm8, 0.25, %v1209_v31 }
 0x109   :  { %v446_v48 = vadd.f32 %v438_v30, %v398_v27 }
 0x10a   :  { %1165 = vset.pattern.permute.xlu0 %v1217_v33 }
 0x10b   :  { %745 = vperm.xlu0 %1165, %v1268_v6   ;;  %v317_v18 = vpop.permute.xlu1 %316 }
 0x10c   :  { %vm335_vm9 = vcmp.eq.s32.totalorder %v317_v18, %v1348_v29  ;;  %v368_v51 = vpop.permute.xlu2 %367 }
 0x10d   :  { %v343_v50 = vsel %vm335_vm9, 0.6, %v1209_v31  ;;  %vm384_vm10 = vcmp.eq.s32.totalorder %v368_v51, %v1348_v29  ;;  %523 = vperm.xlu1 %1151, %v1276_v7   ;;  %1152 = vset.pattern.permute.xlu2 %v1213_v35 }
 0x10e   :  { %v351_v53 = vadd.f32 %v343_v50, %v303_v11  ;;  %v392_v26 = vsel %vm384_vm10, 0.4, %v1209_v31  ;;  %550 = vperm.xlu2 %1152, %v1250_v3   ;;  %v425_v54 = vpop.permute.xlu0 %424 }
 0x10f   :  { %v400_v57 = vadd.f32 %v392_v26, %v352_v17  ;;  %vm435_vm11 = vcmp.eq.s32.totalorder %v425_v54, %v1348_v29 }
 0x110   :  { %v443_v6 = vsel %vm435_vm11, 0.25, %v1209_v31 }
 0x111   :  { %v451_v59 = vadd.f32 %v443_v6, %v403_v43 }
 0x113   :  { %760 = vperm.xlu0 %1165, %v1281_v8   ;;  %v323_v60 = vpop.permute.xlu1 %322 }
 0x114   :  { %vm337_vm12 = vcmp.eq.s32.totalorder %v323_v60, %v1348_v29  ;;  %v374_v62 = vpop.permute.xlu2 %373 }
 0x115   :  { %v345_v23 = vsel %vm337_vm12, 0.6, %v1209_v31  ;;  %vm386_vm13 = vcmp.eq.s32.totalorder %v374_v62, %v1348_v29  ;;  %1154 = vset.pattern.permute.xlu1 %v1213_v35 }
 0x116   :  { %v353_v61 = vadd.f32 %v345_v23, %v305_v25  ;;  %v394_v52 = vsel %vm386_vm13, 0.4, %v1209_v31  ;;  %556 = vperm.xlu1 %1154, %v1245_v2   ;;  %559 = vperm.xlu2 %1152, %v1263_v5  }
 0x117   :  { %v402_v63 = vadd.f32 %v394_v52, %v354_v42  ;;  %v458_v38 = vpop.permute.xlu0 %457 }
 0x118   :  { %vm478_vm14 = vcmp.eq.s32.totalorder %v458_v38, %v1348_v29 }
 0x119   :  { %v486_v8 = vsel %vm478_vm14, 0.1, %v1209_v31 }
 0x11a   :  { %v494_v15 = vadd.f32 %v486_v8, %v446_v48 }
 0x11b   :  { %v332_v9 = vpop.permute.xlu1 %331 }
 0x11c   :  { %vm340_vm15 = vcmp.eq.s32.totalorder %v332_v9, %v1348_v29 }
 0x11d   :  { %v348_v13 = vsel %vm340_vm15, 0.6, %v1209_v31  ;;  %v407_v35 = vpop.permute.xlu2 %406 }
 0x11e   :  { %v356_v40 = vadd.f32 %v348_v13, %v308_v47  ;;  %vm429_vm0 = vcmp.eq.s32.totalorder %v407_v35, %v1348_v29  ;;  %562 = vperm.xlu1 %1154, %v1240_v1   ;;  %565 = vperm.xlu2 %1152, %v1258_v4  }
 0x11f   :  { %v437_v55 = vsel %vm429_vm0, 0.25, %v1209_v31  ;;  %v473_v11 = vpop.permute.xlu0 %472 }
 0x120   :  { %v445_v12 = vadd.f32 %v437_v55, %v397_v21  ;;  %vm483_vm1 = vcmp.eq.s32.totalorder %v473_v11, %v1348_v29 }
 0x121   :  { %v491_v14 = vsel %vm483_vm1, 0.1, %v1209_v31 }
 0x122   :  { %v499_v16 = vadd.f32 %v491_v14, %v451_v59 }
 0x124   :  { %v365_v17 = vpop.permute.xlu1 %364 }
 0x125   :  { %vm383_vm2 = vcmp.eq.s32.totalorder %v365_v17, %v1348_v29  ;;  %v416_v19 = vpop.permute.xlu2 %415  ;;  %v1687_v17 = vld [vmem:[%s2086_s0] sm:$0xff] }
 0x126   :  { %v391_v22 = vsel %vm383_vm2, 0.4, %v1209_v31  ;;  %vm432_vm3 = vcmp.eq.s32.totalorder %v416_v19, %v1348_v29  ;;  %571 = vperm.xlu1 %1154, %v1276_v7   ;;  %1155 = vset.pattern.permute.xlu2 %v1214_v58 }
 0x127   :  { %v399_v24 = vadd.f32 %v391_v22, %v351_v53  ;;  %v440_v27 = vsel %vm432_vm3, 0.25, %v1209_v31  ;;  %598 = vperm.xlu2 %1155, %v1250_v3  }
 0x128   :  { %v448_v28 = vadd.f32 %v440_v27, %v400_v57  ;;  %v506_v34 = vpop.permute.xlu0 %505 }
 0x129   :  { %vm526_vm4 = vcmp.eq.s32.totalorder %v506_v34, %v1348_v29 }
 0x12a   :  { %v534_v44 = vsel %vm526_vm4, 1.0, %v1209_v31 }
 0x12b   :  { %v542_v36 = vadd.f32 %v534_v44, %v494_v15 }
 0x12c   :  { %v371_v56 = vpop.permute.xlu1 %370 }
 0x12d   :  { %vm385_vm5 = vcmp.eq.s32.totalorder %v371_v56, %v1348_v29  ;;  %v422_v25 = vpop.permute.xlu2 %421  ;;  %v1700_v56 = vld [vmem:[%s2086_s0 + $0x10] sm:$0xff] }
 0x12e   :  { %v393_v10 = vsel %vm385_vm5, 0.4, %v1209_v31  ;;  %vm434_vm6 = vcmp.eq.s32.totalorder %v422_v25, %v1348_v29  ;;  %1157 = vset.pattern.permute.xlu1 %v1214_v58  ;;  %v1706_v25 = vld [vmem:[%s2086_s0 + $0x18] sm:$0xff] }
 0x12f   :  { %v401_v39 = vadd.f32 %v393_v10, %v353_v61  ;;  %v442_v42 = vsel %vm434_vm6, 0.25, %v1209_v31  ;;  %604 = vperm.xlu1 %1157, %v1245_v2   ;;  %607 = vperm.xlu2 %1155, %v1263_v5  }
 0x130   :  { %v450_v49 = vadd.f32 %v442_v42, %v402_v63  ;;  %v521_v43 = vpop.permute.xlu0 %520 }
 0x131   :  { %vm531_vm7 = vcmp.eq.s32.totalorder %v521_v43, %v1348_v29 }
 0x132   :  { %v539_v45 = vsel %vm531_vm7, 1.0, %v1209_v31 }
 0x133   :  { %v547_v0 = vadd.f32 %v539_v45, %v499_v16 }
 0x134   :  { %v380_v37 = vpop.permute.xlu1 %379 }
 0x135   :  { %vm388_vm8 = vcmp.eq.s32.totalorder %v380_v37, %v1348_v29 }
 0x136   :  { %v396_v47 = vsel %vm388_vm8, 0.4, %v1209_v31  ;;  %v455_v58 = vpop.permute.xlu2 %454 }
 0x137   :  { %v404_v41 = vadd.f32 %v396_v47, %v356_v40  ;;  %vm477_vm9 = vcmp.eq.s32.totalorder %v455_v58, %v1348_v29  ;;  %610 = vperm.xlu1 %1157, %v1240_v1   ;;  %613 = vperm.xlu2 %1155, %v1258_v4   ;;  %v1727_v58 = vld [vmem:[%s2086_s0 + $0x28] sm:$0xff] }
 0x138   :  { %v485_v20 = vsel %vm477_vm9, 0.1, %v1209_v31 }
 0x139   :  { %v493_v21 = vadd.f32 %v485_v20, %v445_v12  ;;  %v554_v30 = vpop.permute.xlu0 %553 }
 0x13a   :  { %vm574_vm10 = vcmp.eq.s32.totalorder %v554_v30, %v1348_v29  ;;  %v1735_v30 = vld [vmem:[%s2086_s0 + $0x38] sm:$0xff] }
 0x13b   :  { %v582_v48 = vsel %vm574_vm10, 0.6, %v1209_v31 }
 0x13c   :  { %v590_v18 = vadd.f32 %v582_v48, %v542_v36 }
 0x13d   :  { %v413_v51 = vpop.permute.xlu1 %412 }
 0x13e   :  { %vm431_vm11 = vcmp.eq.s32.totalorder %v413_v51, %v1348_v29  ;;  %v464_v50 = vpop.permute.xlu2 %463 }
 0x13f   :  { %v439_v53 = vsel %vm431_vm11, 0.25, %v1209_v31  ;;  %vm480_vm12 = vcmp.eq.s32.totalorder %v464_v50, %v1348_v29  ;;  %619 = vperm.xlu1 %1157, %v1276_v7   ;;  %1158 = vset.pattern.permute.xlu2 %v1215_v46 }
 0x140   :  { %v447_v26 = vadd.f32 %v439_v53, %v399_v24  ;;  %v488_v54 = vsel %vm480_vm12, 0.1, %v1209_v31  ;;  %646 = vperm.xlu2 %1158, %v1250_v3  }
 0x141   :  { %v496_v57 = vadd.f32 %v488_v54, %v448_v28  ;;  %v569_v6 = vpop.permute.xlu0 %568 }
 0x142   :  { %vm579_vm13 = vcmp.eq.s32.totalorder %v569_v6, %v1348_v29 }
 0x143   :  { %v587_v59 = vsel %vm579_vm13, 0.6, %v1209_v31 }
 0x144   :  { %v595_v60 = vadd.f32 %v587_v59, %v547_v0 }
 0x145   :  { %v419_v62 = vpop.permute.xlu1 %418 }
 0x146   :  { %vm433_vm14 = vcmp.eq.s32.totalorder %v419_v62, %v1348_v29  ;;  %v470_v23 = vpop.permute.xlu2 %469 }
 0x147   :  { %v441_v61 = vsel %vm433_vm14, 0.25, %v1209_v31  ;;  %vm482_vm15 = vcmp.eq.s32.totalorder %v470_v23, %v1348_v29  ;;  %1160 = vset.pattern.permute.xlu1 %v1215_v46 }
 0x148   :  { %v449_v52 = vadd.f32 %v441_v61, %v401_v39  ;;  %v490_v3 = vsel %vm482_vm15, 0.1, %v1209_v31  ;;  %652 = vperm.xlu1 %1160, %v1245_v2   ;;  %655 = vperm.xlu2 %1158, %v1263_v5  }
 0x149   :  { %v498_v63 = vadd.f32 %v490_v3, %v450_v49  ;;  %v1715_v49 = vld [vmem:[%s2086_s0 + $0x20] sm:$0xff] }
 0x14a   :  { %v602_v38 = vpop.permute.xlu0 %601 }
 0x14b   :  { %vm622_vm0 = vcmp.eq.s32.totalorder %v602_v38, %v1348_v29  ;;  %v1760_v38 = vld [vmem:[%s2086_s0 + $0x30] sm:$0xff] }
 0x14c   :  { %v630_v8 = vsel %vm622_vm0, 0.4, %v1209_v31 }
 0x14d   :  { %v638_v15 = vadd.f32 %v630_v8, %v590_v18  ;;  %v428_v9 = vpop.permute.xlu1 %427 }
 0x14e   :  { %vm436_vm1 = vcmp.eq.s32.totalorder %v428_v9, %v1348_v29 }
 0x14f   :  { %v444_v13 = vsel %vm436_vm1, 0.25, %v1209_v31  ;;  %v503_v46 = vpop.permute.xlu2 %502 }
 0x150   :  { %v452_v35 = vadd.f32 %v444_v13, %v404_v41  ;;  %vm525_vm2 = vcmp.eq.s32.totalorder %v503_v46, %v1348_v29  ;;  %658 = vperm.xlu1 %1160, %v1240_v1   ;;  %661 = vperm.xlu2 %1158, %v1258_v4  }
 0x151   :  { %v533_v2 = vsel %vm525_vm2, 1.0, %v1209_v31 }
 0x152   :  { %v541_v5 = vadd.f32 %v533_v2, %v493_v21  ;;  %v617_v40 = vpop.permute.xlu0 %616 }
 0x153   :  { %vm627_vm3 = vcmp.eq.s32.totalorder %v617_v40, %v1348_v29 }
 0x154   :  { %v635_v55 = vsel %vm627_vm3, 0.4, %v1209_v31 }
 0x155   :  { %v643_v11 = vadd.f32 %v635_v55, %v595_v60 }
 0x156   :  { %v461_v12 = vpop.permute.xlu1 %460 }
 0x157   :  { %vm479_vm4 = vcmp.eq.s32.totalorder %v461_v12, %v1348_v29  ;;  %v512_v14 = vpop.permute.xlu2 %511 }
 0x158   :  { %v487_v16 = vsel %vm479_vm4, 0.1, %v1209_v31  ;;  %vm528_vm5 = vcmp.eq.s32.totalorder %v512_v14, %v1348_v29  ;;  %667 = vperm.xlu1 %1160, %v1276_v7   ;;  %1161 = vset.pattern.permute.xlu2 %v1216_v32 }
 0x159   :  { %v495_v1 = vadd.f32 %v487_v16, %v447_v26  ;;  %v536_v4 = vsel %vm528_vm5, 1.0, %v1209_v31  ;;  %694 = vperm.xlu2 %1161, %v1687_v17   ;;  %v1220_v16 = vmov 17  }
 0x15a   :  { %v544_v19 = vadd.f32 %v536_v4, %v496_v57 }
 0x15b   :  { %v650_v22 = vpop.permute.xlu0 %649 }
 0x15c   :  { %vm670_vm6 = vcmp.eq.s32.totalorder %v650_v22, %v1348_v29 }
 0x15d   :  { %v678_v24 = vsel %vm670_vm6, 0.25, %v1209_v31 }
 0x15e   :  { %v686_v27 = vadd.f32 %v678_v24, %v638_v15  ;;  %v467_v7 = vpop.permute.xlu1 %466 }
 0x15f   :  { %vm481_vm7 = vcmp.eq.s32.totalorder %v467_v7, %v1348_v29  ;;  %v518_v28 = vpop.permute.xlu2 %517 }
 0x160   :  { %v489_v34 = vsel %vm481_vm7, 0.1, %v1209_v31  ;;  %vm530_vm8 = vcmp.eq.s32.totalorder %v518_v28, %v1348_v29  ;;  %1163 = vset.pattern.permute.xlu1 %v1216_v32  ;;  %v1218_v32 = vmov 16   ;;  %v1221_v28 = vmov 19  }
 0x161   :  { %v497_v44 = vadd.f32 %v489_v34, %v449_v52  ;;  %v538_v36 = vsel %vm530_vm8, 1.0, %v1209_v31  ;;  %700 = vperm.xlu1 %1163, %v1700_v56   ;;  %703 = vperm.xlu2 %1161, %v1706_v25  }
 0x162   :  { %v546_v10 = vadd.f32 %v538_v36, %v498_v63  ;;  %1168 = vset.pattern.permute.xlu0 %v1218_v32  ;;  %v1219_v63 = vmov 18  }
 0x163   :  { %v665_v39 = vpop.permute.xlu0 %664  ;;  %802 = vperm.xlu0 %1168, %v1715_v49  }
 0x164   :  { %vm675_vm9 = vcmp.eq.s32.totalorder %v665_v39, %v1348_v29 }
 0x165   :  { %v683_v42 = vsel %vm675_vm9, 0.25, %v1209_v31 }
 0x166   :  { %v1718_v43 = vadd.f32 %v683_v42, %v643_v11  ;;  %v476_v45 = vpop.permute.xlu1 %475 }
 0x167   :  { %vm484_vm10 = vcmp.eq.s32.totalorder %v476_v45, %v1348_v29 }
 0x168   :  { %v492_v0 = vsel %vm484_vm10, 0.1, %v1209_v31  ;;  %v551_v37 = vpop.permute.xlu2 %550 }
 0x169   :  { %v500_v47 = vadd.f32 %v492_v0, %v452_v35  ;;  %vm573_vm11 = vcmp.eq.s32.totalorder %v551_v37, %v1348_v29  ;;  %706 = vperm.xlu1 %1163, %v1715_v49   ;;  %709 = vperm.xlu2 %1161, %v1727_v58  }
 0x16a   :  { %v581_v41 = vsel %vm573_vm11, 0.6, %v1209_v31 }
 0x16b   :  { %v589_v20 = vadd.f32 %v581_v41, %v541_v5  ;;  %811 = vperm.xlu0 %1168, %v1735_v30  }
 0x16c   :  { %v698_v21 = vpop.permute.xlu0 %697 }
 0x16d   :  { %vm718_vm12 = vcmp.eq.s32.totalorder %v698_v21, %v1348_v29 }
 0x16e   :  { %v726_v48 = vsel %vm718_vm12, 0.1, %v1209_v31 }
 0x16f   :  { %v734_v18 = vadd.f32 %v726_v48, %v686_v27  ;;  %v509_v51 = vpop.permute.xlu1 %508 }
 0x170   :  { %vm527_vm13 = vcmp.eq.s32.totalorder %v509_v51, %v1348_v29  ;;  %v560_v50 = vpop.permute.xlu2 %559 }
 0x171   :  { %v535_v53 = vsel %vm527_vm13, 1.0, %v1209_v31  ;;  %vm576_vm14 = vcmp.eq.s32.totalorder %v560_v50, %v1348_v29  ;;  %715 = vperm.xlu1 %1163, %v1735_v30   ;;  %1164 = vset.pattern.permute.xlu2 %v1217_v33 }
 0x172   :  { %v543_v26 = vadd.f32 %v535_v53, %v495_v1  ;;  %v584_v54 = vsel %vm576_vm14, 0.6, %v1209_v31  ;;  %742 = vperm.xlu2 %1164, %v1687_v17   ;;  %v1784_v1 = vld [vmem:[%s2086_s0 + $0x8] sm:$0xff] }
 0x173   :  { %v592_v57 = vadd.f32 %v584_v54, %v544_v19  ;;  %1177 = vset.pattern.permute.xlu0 %v1219_v63 }
 0x174   :  { %v1746_v6 = vpop.permute.xlu0 %712  ;;  %904 = vperm.xlu0 %1177, %v1760_v38  }
 0x177   :  { %v515_v59 = vpop.permute.xlu1 %514 }
 0x178   :  { %vm529_vm15 = vcmp.eq.s32.totalorder %v515_v59, %v1348_v29  ;;  %v566_v60 = vpop.permute.xlu2 %565 }
 0x179   :  { %v537_v62 = vsel %vm529_vm15, 1.0, %v1209_v31  ;;  %vm578_vm0 = vcmp.eq.s32.totalorder %v566_v60, %v1348_v29  ;;  %1166 = vset.pattern.permute.xlu1 %v1217_v33 }
 0x17a   :  { %v545_v23 = vadd.f32 %v537_v62, %v497_v44  ;;  %v586_v61 = vsel %vm578_vm0, 0.6, %v1209_v31  ;;  %748 = vperm.xlu1 %1166, %v1700_v56   ;;  %751 = vperm.xlu2 %1164, %v1706_v25  }
 0x17b   :  { %v594_v52 = vadd.f32 %v586_v61, %v546_v10 }
 0x17c   :  { %886 = vperm.xlu0 %1177, %v1687_v17  }
 0x17d   :  { %v746_v3 = vpop.permute.xlu0 %745 }
 0x17e   :  { %vm766_vm1 = vcmp.eq.s32.totalorder %v746_v3, %v1348_v29 }
 0x17f   :  { %v774_v33 = vsel %vm766_vm1, 1.0, %v1209_v31  ;;  %v524_v8 = vpop.permute.xlu1 %523 }
 0x180   :  { %v1764_v15 = vadd.f32 %v774_v33, %v734_v18  ;;  %vm532_vm2 = vcmp.eq.s32.totalorder %v524_v8, %v1348_v29 }
 0x181   :  { %v540_v9 = vsel %vm532_vm2, 1.0, %v1209_v31  ;;  %v599_v13 = vpop.permute.xlu2 %598 }
 0x182   :  { %v548_v46 = vadd.f32 %v540_v9, %v500_v47  ;;  %vm621_vm3 = vcmp.eq.s32.totalorder %v599_v13, %v1348_v29  ;;  %754 = vperm.xlu1 %1166, %v1715_v49   ;;  %757 = vperm.xlu2 %1164, %v1727_v58  }
 0x183   :  { %v629_v35 = vsel %vm621_vm3, 0.4, %v1209_v31 }
 0x184   :  { %v637_v2 = vadd.f32 %v629_v35, %v589_v20  ;;  %1187 = vset.pattern.permute.xlu0 %v1220_v16  ;;  %v995_v35 = vld [vmem:[%s2087_s1 + $0x70] sm:$0xff] }
 0x185   :  { %841 = vperm.xlu0 %1187, %v1784_v1  }
 0x188   :  { %v557_v5 = vpop.permute.xlu1 %556 }
 0x189   :  { %vm575_vm4 = vcmp.eq.s32.totalorder %v557_v5, %v1348_v29  ;;  %v608_v40 = vpop.permute.xlu2 %607 }
 0x18a   :  { %v583_v55 = vsel %vm575_vm4, 0.6, %v1209_v31  ;;  %vm624_vm5 = vcmp.eq.s32.totalorder %v608_v40, %v1348_v29  ;;  %763 = vperm.xlu1 %1166, %v1735_v30   ;;  %1167 = vset.pattern.permute.xlu2 %v1218_v32 }
 0x18b   :  { %v591_v11 = vadd.f32 %v583_v55, %v543_v26  ;;  %v632_v12 = vsel %vm624_vm5, 0.4, %v1209_v31  ;;  %790 = vperm.xlu2 %1167, %v1687_v17  }
 0x18c   :  { %v640_v14 = vadd.f32 %v632_v12, %v592_v57 }
 0x18d   :  { %1188 = vset.pattern.permute.xlu0 %v1221_v28 }
 0x18e   :  { %940 = vperm.xlu0 %1188, %v1700_v56  }
 0x190   :  { %v563_v4 = vpop.permute.xlu1 %562 }
 0x191   :  { %vm577_vm6 = vcmp.eq.s32.totalorder %v563_v4, %v1348_v29  ;;  %v614_v19 = vpop.permute.xlu2 %613 }
 0x192   :  { %v585_v22 = vsel %vm577_vm6, 0.6, %v1209_v31  ;;  %vm626_vm7 = vcmp.eq.s32.totalorder %v614_v19, %v1348_v29  ;;  %1169 = vset.pattern.permute.xlu1 %v1218_v32  ;;  %v991_v19 = vld [vmem:[%s2087_s1 + $0x50] sm:$0xff] }
 0x193   :  { %v593_v24 = vadd.f32 %v585_v22, %v545_v23  ;;  %v634_v27 = vsel %vm626_vm7, 0.4, %v1209_v31  ;;  %808 = vperm.xlu1 %1169, %v1760_v38   ;;  %1170 = vset.pattern.permute.xlu2 %v1220_v16  ;;  %v990_v22 = vld [vmem:[%s2087_s1 + $0x48] sm:$0xff] }
 0x194   :  { %v642_v7 = vadd.f32 %v634_v27, %v594_v52  ;;  %850 = vperm.xlu2 %1170, %v1715_v49   ;;  %v1885_v27 = vld [vmem:[%s2087_s1 + $0x40] sm:$0xff] }
 0x196   :  { %943 = vperm.xlu0 %1188, %v1706_v25  }
 0x198   :  { %v572_v34 = vpop.permute.xlu1 %571 }
 0x199   :  { %vm580_vm8 = vcmp.eq.s32.totalorder %v572_v34, %v1348_v29 }
 0x19a   :  { %v588_v44 = vsel %vm580_vm8, 0.6, %v1209_v31  ;;  %v647_v36 = vpop.permute.xlu2 %646 }
 0x19b   :  { %v596_v10 = vadd.f32 %v588_v44, %v548_v46  ;;  %vm669_vm9 = vcmp.eq.s32.totalorder %v647_v36, %v1348_v29  ;;  %1171 = vset.pattern.permute.xlu1 %v1220_v16  ;;  %v996_v46 = vld [vmem:[%s2087_s1 + $0x78] sm:$0xff] }
 0x19c   :  { %v677_v39 = vsel %vm669_vm9, 0.25, %v1209_v31  ;;  %856 = vperm.xlu1 %1171, %v1760_v38   ;;  %1172 = vset.pattern.permute.xlu2 %v1219_v63  ;;  %v988_v36 = vld [vmem:[%s2087_s1 + $0x38] sm:$0xff] }
 0x19d   :  { %v685_v42 = vadd.f32 %v677_v39, %v637_v2  ;;  %898 = vperm.xlu2 %1172, %v1715_v49   ;;  %1051 = vmatpush.msra.mxu2 %v996_v46  ;;  %v994_v2 = vld [vmem:[%s2087_s1 + $0x68] sm:$0xff]  ;;  %v987_v39 = vld [vmem:[%s2087_s1 + $0x30] sm:$0xff] }
 0x19e   :  { %1052 = vmatpush.msra.mxu3 %v996_v46  ;;  %997 = vmatpush.msra.mxu0 %v996_v46 }
 0x19f   :  { %1054 = vmatpush.msra.mxu2 %v995_v35  ;;  %1050 = vmatpush.msra.mxu1 %v996_v46 }
 0x1a0   :  { %1055 = vmatpush.msra.mxu3 %v995_v35  ;;  %998 = vmatpush.msra.mxu0 %v995_v35 }
 0x1a1   :  { %v605_v45 = vpop.permute.xlu1 %604  ;;  %1057 = vmatpush.msra.mxu2 %v994_v2  ;;  %1053 = vmatpush.msra.mxu1 %v995_v35 }
 0x1a2   :  { %vm623_vm10 = vcmp.eq.s32.totalorder %v605_v45, %v1348_v29  ;;  %v656_v0 = vpop.permute.xlu2 %655  ;;  %1058 = vmatpush.msra.mxu3 %v994_v2  ;;  %999 = vmatpush.msra.mxu0 %v994_v2 }
 0x1a3   :  { %v631_v37 = vsel %vm623_vm10, 0.4, %v1209_v31  ;;  %vm672_vm11 = vcmp.eq.s32.totalorder %v656_v0, %v1348_v29  ;;  %1056 = vmatpush.msra.mxu1 %v994_v2 }
 0x1a4   :  { %v639_v47 = vadd.f32 %v631_v37, %v591_v11  ;;  %v680_v41 = vsel %vm672_vm11, 0.25, %v1209_v31  ;;  %1173 = vset.pattern.permute.xlu1 %v1218_v32  ;;  %v985_v37 = vld [vmem:[%s2087_s1 + $0x20] sm:$0xff] }
 0x1a5   :  { %v688_v20 = vadd.f32 %v680_v41, %v640_v14  ;;  %796 = vperm.xlu1 %1173, %v1700_v56   ;;  %1174 = vset.pattern.permute.xlu2 %v1221_v28  ;;  %v992_v14 = vld [vmem:[%s2087_s1 + $0x58] sm:$0xff] }
 0x1a6   :  { %946 = vperm.xlu2 %1174, %v1715_v49  }
 0x1a9   :  { %v611_v21 = vpop.permute.xlu1 %610 }
 0x1aa   :  { %vm625_vm12 = vcmp.eq.s32.totalorder %v611_v21, %v1348_v29  ;;  %v662_v48 = vpop.permute.xlu2 %661  ;;  %v982_v21 = vld [vmem:[%s2087_s1 + $0x8] sm:$0xff] }
 0x1ab   :  { %v633_v18 = vsel %vm625_vm12, 0.4, %v1209_v31  ;;  %vm674_vm13 = vcmp.eq.s32.totalorder %v662_v48, %v1348_v29  ;;  %v981_v48 = vld [vmem:[%s2087_s1] sm:$0xff] }
 0x1ac   :  { %v1817_v51 = vadd.f32 %v633_v18, %v593_v24  ;;  %v682_v50 = vsel %vm674_vm13, 0.25, %v1209_v31 }
 0x1ad   :  { %v690_v53 = vadd.f32 %v682_v50, %v642_v7  ;;  %1175 = vset.pattern.permute.xlu1 %v1221_v28 }
 0x1ae   :  { %952 = vperm.xlu1 %1175, %v1760_v38   ;;  %1176 = vset.pattern.permute.xlu2 %v1218_v32 }
 0x1af   :  { %805 = vperm.xlu2 %1176, %v1727_v58  }
 0x1b1   :  { %v620_v49 = vpop.permute.xlu1 %619 }
 0x1b2   :  { %vm628_vm14 = vcmp.eq.s32.totalorder %v620_v49, %v1348_v29  ;;  %v1946_v49 = vpop.permute.xlu0 %760 }
 0x1b3   :  { %v636_v26 = vsel %vm628_vm14, 0.4, %v1209_v31  ;;  %v695_v54 = vpop.permute.xlu2 %694 }
 0x1b4   :  { %v644_v57 = vadd.f32 %v636_v26, %v596_v10  ;;  %vm717_vm15 = vcmp.eq.s32.totalorder %v695_v54, %v1348_v29 }
 0x1b5   :  { %v725_v59 = vsel %vm717_vm15, 0.1, %v1209_v31 }
 0x1b6   :  { %v733_v60 = vadd.f32 %v725_v59, %v685_v42  ;;  %1178 = vset.pattern.permute.xlu1 %v1220_v16  ;;  %v986_v42 = vld [vmem:[%s2087_s1 + $0x28] sm:$0xff] }
 0x1b7   :  { %838 = vperm.xlu1 %1178, %v1687_v17   ;;  %1179 = vset.pattern.permute.xlu2 %v1220_v16 }
 0x1b8   :  { %844 = vperm.xlu2 %1179, %v1700_v56  }
 0x1ba   :  { %v653_v62 = vpop.permute.xlu1 %652 }
 0x1bb   :  { %vm671_vm0 = vcmp.eq.s32.totalorder %v653_v62, %v1348_v29  ;;  %v704_v23 = vpop.permute.xlu2 %703 }
 0x1bc   :  { %v679_v61 = vsel %vm671_vm0, 0.25, %v1209_v31  ;;  %vm720_vm1 = vcmp.eq.s32.totalorder %v704_v23, %v1348_v29 }
 0x1bd   :  { %v687_v52 = vadd.f32 %v679_v61, %v639_v47  ;;  %v728_v3 = vsel %vm720_vm1, 0.1, %v1209_v31  ;;  %v984_v47 = vld [vmem:[%s2087_s1 + $0x18] sm:$0xff] }
 0x1be   :  { %v1836_v38 = vadd.f32 %v728_v3, %v688_v20  ;;  %v983_v20 = vld [vmem:[%s2087_s1 + $0x10] sm:$0xff] }
 0x1bf   :  { %853 = vperm.xlu1 %1178, %v1727_v58  }
 0x1c0   :  { %859 = vperm.xlu2 %1179, %v1735_v30  }
 0x1c2   :  { %v1840_v33 = vpop.permute.xlu1 %658 }
 0x1c3   :  { %v710_v8 = vpop.permute.xlu2 %709  ;;  %vm673_vm9 = vcmp.eq.s32.totalorder %v1840_v33, %v1348_v29 }
 0x1c4   :  { %vm722_vm2 = vcmp.eq.s32.totalorder %v710_v8, %v1348_v29 }
 0x1c5   :  { %v730_v9 = vsel %vm722_vm2, 0.1, %v1209_v31  ;;  %vm723_vm2 = vcmp.eq.s32.totalorder %v1746_v6, %v1348_v29 }
 0x1c6   :  { %v1844_v13 = vadd.f32 %v730_v9, %v690_v53 }
 0x1c7   :  { %1180 = vset.pattern.permute.xlu1 %v1219_v63 }
 0x1c8   :  { %892 = vperm.xlu1 %1180, %v1700_v56   ;;  %1181 = vset.pattern.permute.xlu2 %v1219_v63  ;;  %v993_v56 = vld [vmem:[%s2087_s1 + $0x60] sm:$0xff] }
 0x1c9   :  { %901 = vperm.xlu2 %1181, %v1727_v58   ;;  %1060 = vmatpush.msra.mxu2 %v993_v56 }
 0x1ca   :  { %v668_v5 = vpop.permute.xlu1 %667  ;;  %1061 = vmatpush.msra.mxu3 %v993_v56  ;;  %1000 = vmatpush.msra.mxu0 %v993_v56 }
 0x1cb   :  { %vm676_vm3 = vcmp.eq.s32.totalorder %v668_v5, %v1348_v29  ;;  %1063 = vmatpush.msra.mxu2 %v992_v14  ;;  %1059 = vmatpush.msra.mxu1 %v993_v56 }
 0x1cc   :  { %v684_v40 = vsel %vm676_vm3, 0.25, %v1209_v31  ;;  %v743_v55 = vpop.permute.xlu2 %742  ;;  %1064 = vmatpush.msra.mxu3 %v992_v14  ;;  %1001 = vmatpush.msra.mxu0 %v992_v14  ;;  %vm771_vm3 = vcmp.eq.s32.totalorder %v1946_v49, %v1348_v29 }
 0x1cd   :  { %v1864_v11 = vadd.f32 %v684_v40, %v644_v57  ;;  %vm765_vm4 = vcmp.eq.s32.totalorder %v743_v55, %v1348_v29  ;;  %1066 = vmatpush.msra.mxu2 %v991_v19  ;;  %1062 = vmatpush.msra.mxu1 %v992_v14  ;;  %v681_v57 = vsel %vm673_vm9, 0.25, %v1209_v31  ;;  %v779_v14 = vsel %vm771_vm3, 1.0, %v1209_v31 }
 0x1ce   :  { %v773_v12 = vsel %vm765_vm4, 1.0, %v1209_v31  ;;  %1067 = vmatpush.msra.mxu3 %v991_v19  ;;  %1002 = vmatpush.msra.mxu0 %v991_v19  ;;  %v689_v62 = vadd.f32 %v681_v57, %v1817_v51 }
 0x1cf   :  { %v1871_v4 = vadd.f32 %v773_v12, %v733_v60  ;;  %1069 = vmatpush.msra.mxu2 %v990_v22  ;;  %1065 = vmatpush.msra.mxu1 %v991_v19  ;;  %v731_v12 = vsel %vm723_vm2, 0.1, %v1209_v31 }
 0x1d0   :  { %907 = vperm.xlu1 %1180, %v1735_v30   ;;  %1070 = vmatpush.msra.mxu3 %v990_v22  ;;  %v739_v19 = vadd.f32 %v731_v12, %v1718_v43 }
 0x1d1   :  { %1182 = vset.pattern.permute.xlu2 %v1221_v28  ;;  %1072 = vmatpush.msra.mxu2 %v1885_v27 }
 0x1d2   :  { %934 = vperm.xlu2 %1182, %v1687_v17   ;;  %1073 = vmatpush.msra.mxu3 %v1885_v27 }
 0x1d3   :  { %v701_v24 = vpop.permute.xlu1 %700  ;;  %1075 = vmatpush.msra.mxu2 %v988_v36  ;;  %1003 = vmatpush.msra.mxu0 %v990_v22 }
 0x1d4   :  { %vm719_vm5 = vcmp.eq.s32.totalorder %v701_v24, %v1348_v29  ;;  %v752_v7 = vpop.permute.xlu2 %751  ;;  %1076 = vmatpush.msra.mxu3 %v988_v36  ;;  %1068 = vmatpush.msra.mxu1 %v990_v22 }
 0x1d5   :  { %v727_v34 = vsel %vm719_vm5, 0.1, %v1209_v31  ;;  %vm768_vm6 = vcmp.eq.s32.totalorder %v752_v7, %v1348_v29  ;;  %1078 = vmatpush.msra.mxu2 %v987_v39  ;;  %1004 = vmatpush.msra.mxu0 %v1885_v27  ;;  %v803_v59 = vpop.permute.xlu0 %802  ;;  %v787_v7 = vadd.f32 %v779_v14, %v739_v19 }
 0x1d6   :  { %v1891_v17 = vadd.f32 %v727_v34, %v687_v52  ;;  %v776_v44 = vsel %vm768_vm6, 1.0, %v1209_v31  ;;  %1079 = vmatpush.msra.mxu3 %v987_v39  ;;  %1071 = vmatpush.msra.mxu1 %v1885_v27  ;;  %vm817_vm12 = vcmp.eq.s32.totalorder %v803_v59, %v1348_v29 }
 0x1d7   :  { %v1898_v10 = vadd.f32 %v776_v44, %v1836_v38  ;;  %1081 = vmatpush.msra.mxu2 %v986_v42  ;;  %1005 = vmatpush.msra.mxu0 %v988_v36  ;;  %v825_v3 = vsel %vm817_vm12, 0.6, %v1209_v31 }
 0x1d8   :  { %1183 = vset.pattern.permute.xlu1 %v1218_v32  ;;  %1082 = vmatpush.msra.mxu3 %v986_v42 }
 0x1d9   :  { %793 = vperm.xlu1 %1183, %v1784_v1   ;;  %1084 = vmatpush.msra.mxu2 %v985_v37 }
 0x1da   :  { %1184 = vset.pattern.permute.xlu2 %v1218_v32  ;;  %1085 = vmatpush.msra.mxu3 %v985_v37 }
 0x1db   :  { %v1910_v45 = vpop.permute.xlu1 %706  ;;  %799 = vperm.xlu2 %1184, %v1706_v25   ;;  %1087 = vmatpush.msra.mxu2 %v984_v47 }
 0x1dc   :  { %v758_v0 = vpop.permute.xlu2 %757  ;;  %1088 = vmatpush.msra.mxu3 %v984_v47  ;;  %1006 = vmatpush.msra.mxu0 %v987_v39  ;;  %vm721_vm11 = vcmp.eq.s32.totalorder %v1910_v45, %v1348_v29 }
 0x1dd   :  { %vm770_vm7 = vcmp.eq.s32.totalorder %v758_v0, %v1348_v29  ;;  %1090 = vmatpush.msra.mxu2 %v983_v20  ;;  %1074 = vmatpush.msra.mxu1 %v988_v36  ;;  %v729_v60 = vsel %vm721_vm11, 0.1, %v1209_v31  ;;  %v1985_v55 = vpop.permute.xlu0 %811 }
 0x1de   :  { %v778_v32 = vsel %vm770_vm7, 1.0, %v1209_v31  ;;  %1091 = vmatpush.msra.mxu3 %v983_v20  ;;  %1007 = vmatpush.msra.mxu0 %v986_v42  ;;  %v737_v61 = vadd.f32 %v729_v60, %v689_v62 }
 0x1df   :  { %v1923_v41 = vadd.f32 %v778_v32, %v1844_v13  ;;  %1093 = vmatpush.msra.mxu2 %v982_v21  ;;  %1077 = vmatpush.msra.mxu1 %v987_v39 }
 0x1e0   :  { %1094 = vmatpush.msra.mxu3 %v982_v21  ;;  %1008 = vmatpush.msra.mxu0 %v985_v37 }
 0x1e1   :  { %1185 = vset.pattern.permute.xlu1 %v1221_v28  ;;  %1096 = vmatpush.msra.mxu2 %v981_v48 }
 0x1e2   :  { %949 = vperm.xlu1 %1185, %v1727_v58   ;;  %1097 = vmatpush.msra.mxu3 %v981_v48 }
 0x1e3   :  { %v716_v18 = vpop.permute.xlu1 %715  ;;  %1186 = vset.pattern.permute.xlu2 %v1221_v28  ;;  %1009 = vmatpush.msra.mxu0 %v984_v47 }
 0x1e4   :  { %vm724_vm8 = vcmp.eq.s32.totalorder %v716_v18, %v1348_v29  ;;  %955 = vperm.xlu2 %1186, %v1735_v30   ;;  %1080 = vmatpush.msra.mxu1 %v986_v42 }
 0x1e5   :  { %v732_v58 = vsel %vm724_vm8, 0.1, %v1209_v31  ;;  %v1943_v53 = vpop.permute.xlu2 %790  ;;  %1010 = vmatpush.msra.mxu0 %v983_v20 }
 0x1e6   :  { %v1941_v50 = vadd.f32 %v732_v58, %v1864_v11  ;;  %1083 = vmatpush.msra.mxu1 %v985_v37  ;;  %v905_v27 = vpop.permute.xlu0 %904  ;;  %vm813_vm8 = vcmp.eq.s32.totalorder %v1943_v53, %v1348_v29 }
 0x1e7   :  { %1011 = vmatpush.msra.mxu0 %v982_v21  ;;  %vm915_vm6 = vcmp.eq.s32.totalorder %v905_v27, %v1348_v29  ;;  %v821_v32 = vsel %vm813_vm8, 0.6, %v1209_v31 }
 0x1e8   :  { %1086 = vmatpush.msra.mxu1 %v984_v47  ;;  %v923_v36 = vsel %vm915_vm6, 0.25, %v1209_v31 }
 0x1e9   :  { %1012 = vmatpush.msra.mxu0 %v981_v48 }
 0x1ea   :  { %1189 = vset.pattern.permute.xlu1 %v1220_v16  ;;  %1089 = vmatpush.msra.mxu1 %v983_v20 }
 0x1eb   :  { %847 = vperm.xlu1 %1189, %v1706_v25  }
 0x1ec   :  { %v749_v30 = vpop.permute.xlu1 %748  ;;  %1190 = vset.pattern.permute.xlu2 %v1219_v63  ;;  %1092 = vmatpush.msra.mxu1 %v982_v21 }
 0x1ed   :  { %vm767_vm10 = vcmp.eq.s32.totalorder %v749_v30, %v1348_v29  ;;  %889 = vperm.xlu2 %1190, %v1784_v1  }
 0x1ee   :  { %v775_v26 = vsel %vm767_vm10, 1.0, %v1209_v31  ;;  %v851_v54 = vpop.permute.xlu2 %850  ;;  %1095 = vmatpush.msra.mxu1 %v981_v48  ;;  %v887_v45 = vpop.permute.xlu0 %886 }
 0x1ef   :  { %v1959_v16 = vadd.f32 %v775_v26, %v1891_v17  ;;  %vm865_vm14 = vcmp.eq.s32.totalorder %v851_v54, %v1348_v29  ;;  %vm909_vm9 = vcmp.eq.s32.totalorder %v887_v45, %v1348_v29 }
 0x1f0   :  { %v917_v21 = vsel %vm909_vm9, 0.25, %v1209_v31 }
 0x1f3   :  { %1191 = vset.pattern.permute.xlu1 %v1219_v63 }
 0x1f4   :  { %v755_v23 = vpop.permute.xlu1 %754  ;;  %895 = vperm.xlu1 %1191, %v1706_v25   ;;  %v873_v25 = vsel %vm865_vm14, 0.4, %v1209_v31 }
 0x1f5   :  { %vm769_vm13 = vcmp.eq.s32.totalorder %v755_v23, %v1348_v29  ;;  %1192 = vset.pattern.permute.xlu2 %v1221_v28 }
 0x1f6   :  { %v777_v52 = vsel %vm769_vm13, 1.0, %v1209_v31  ;;  %937 = vperm.xlu2 %1192, %v1784_v1  }
 0x1f7   :  { %v785_v63 = vadd.f32 %v777_v52, %v737_v61  ;;  %v899_v51 = vpop.permute.xlu2 %898  ;;  %v842_v58 = vpop.permute.xlu0 %841 }
 0x1f8   :  { %vm913_vm15 = vcmp.eq.s32.totalorder %v899_v51, %v1348_v29 }
 0x1f9   :  { %v833_v38 = vadd.f32 %v825_v3, %v785_v63  ;;  %v921_v28 = vsel %vm913_vm15, 0.25, %v1209_v31 }
 0x1fb   :  { %v881_v8 = vadd.f32 %v873_v25, %v833_v38 }
 0x1fc   :  { %v1975_v33 = vpop.permute.xlu1 %763 }
 0x1fd   :  { %v929_v13 = vadd.f32 %v921_v28, %v881_v8  ;;  %vm772_vm14 = vcmp.eq.s32.totalorder %v1975_v33, %v1348_v29 }
 0x1fe   :  { %v780_v62 = vsel %vm772_vm14, 1.0, %v1209_v31 }
 0x1ff   :  { %v788_v63 = vadd.f32 %v780_v62, %v1941_v50 }
 0x200   :  { %v947_v9 = vpop.permute.xlu2 %946  ;;  %v941_v57 = vpop.permute.xlu0 %940 }
 0x201   :  { %vm961_vm0 = vcmp.eq.s32.totalorder %v947_v9, %v1348_v29  ;;  %vm959_vm15 = vcmp.eq.s32.totalorder %v941_v57, %v1348_v29 }
 0x202   :  { %v969_v1 = vsel %vm961_vm0, 0.1, %v1209_v31  ;;  %vm820_vm0 = vcmp.eq.s32.totalorder %v1985_v55, %v1348_v29  ;;  %v967_v3 = vsel %vm959_vm15, 0.1, %v1209_v31 }
 0x203   :  { %v977_v46 = vadd.f32 %v969_v1, %v929_v13  ;;  %v828_v51 = vsel %vm820_vm0, 0.6, %v1209_v31 }
 0x204   :  { %v836_v8 = vadd.f32 %v828_v51, %v788_v63 }
 0x205   :  { %v809_v35 = vpop.permute.xlu1 %808  ;;  %1025 = vmatmul.f32.vlgmr.msra.gmra.mxu2 %v977_v46 }
 0x206   :  { %vm819_vm4 = vcmp.eq.s32.totalorder %v809_v35, %v1348_v29 }
 0x207   :  { %v827_v24 = vsel %vm819_vm4, 0.6, %v1209_v31 }
 0x208   :  { %v835_v34 = vadd.f32 %v827_v24, %v787_v7 }
 0x209   :  { %v806_v2 = vpop.permute.xlu2 %805 }
 0x20a   :  { %vm818_vm1 = vcmp.eq.s32.totalorder %v806_v2, %v1348_v29 }
 0x20b   :  { %v826_v5 = vsel %vm818_vm1, 0.6, %v1209_v31 }
 0x20c   :  { %v1983_v56 = vadd.f32 %v826_v5, %v1923_v41  ;;  %v829_v41 = vadd.f32 %v821_v32, %v1871_v4 }
 0x20e   :  { %v857_v40 = vpop.permute.xlu1 %856 }
 0x20f   :  { %vm867_vm5 = vcmp.eq.s32.totalorder %v857_v40, %v1348_v29 }
 0x210   :  { %v875_v6 = vsel %vm867_vm5, 0.4, %v1209_v31  ;;  %vm862_vm5 = vcmp.eq.s32.totalorder %v842_v58, %v1348_v29 }
 0x211   :  { %v883_v44 = vadd.f32 %v875_v6, %v835_v34  ;;  %v870_v5 = vsel %vm862_vm5, 0.4, %v1209_v31 }
 0x212   :  { %v845_v11 = vpop.permute.xlu2 %844 }
 0x213   :  { %v931_v42 = vadd.f32 %v923_v36, %v883_v44  ;;  %vm863_vm13 = vcmp.eq.s32.totalorder %v845_v11, %v1348_v29 }
 0x214   :  { %v871_v60 = vsel %vm863_vm13, 0.4, %v1209_v31 }
 0x217   :  { %v797_v22 = vpop.permute.xlu1 %796 }
 0x218   :  { %vm815_vm12 = vcmp.eq.s32.totalorder %v797_v22, %v1348_v29 }
 0x219   :  { %v823_v4 = vsel %vm815_vm12, 0.6, %v1209_v31 }
 0x21a   :  { %v860_v17 = vpop.permute.xlu2 %859  ;;  %v831_v59 = vadd.f32 %v823_v4, %v1959_v16 }
 0x21b   :  { %vm868_vm2 = vcmp.eq.s32.totalorder %v860_v17, %v1348_v29 }
 0x21c   :  { %v879_v61 = vadd.f32 %v871_v60, %v831_v59  ;;  %v876_v33 = vsel %vm868_vm2, 0.4, %v1209_v31 }
 0x21d   :  { %v884_v9 = vadd.f32 %v876_v33, %v836_v8 }
 0x220   :  { %v953_v39 = vpop.permute.xlu1 %952 }
 0x221   :  { %vm963_vm7 = vcmp.eq.s32.totalorder %v953_v39, %v1348_v29 }
 0x222   :  { %v971_v43 = vsel %vm963_vm7, 0.1, %v1209_v31 }
 0x223   :  { %v2002_v0 = vpop.permute.xlu2 %901  ;;  %v979_v37 = vadd.f32 %v971_v43, %v931_v42  ;;  %v944_v42 = vpop.permute.xlu0 %943 }
 0x224   :  { %vm914_vm9 = vcmp.eq.s32.totalorder %v2002_v0, %v1348_v29  ;;  %vm960_vm14 = vcmp.eq.s32.totalorder %v944_v42, %v1348_v29 }
 0x225   :  { %1031 = vmatmul.f32.vlgmr.msra.gmra.mxu3 %v979_v37  ;;  %v922_v24 = vsel %vm914_vm9, 0.25, %v1209_v31 }
 0x229   :  { %v839_v47 = vpop.permute.xlu1 %838 }
 0x22a   :  { %vm861_vm10 = vcmp.eq.s32.totalorder %v839_v47, %v1348_v29  ;;  %v968_v47 = vsel %vm960_vm14, 0.1, %v1209_v31 }
 0x22b   :  { %v869_v20 = vsel %vm861_vm10, 0.4, %v1209_v31 }
 0x22c   :  { %v877_v48 = vadd.f32 %v869_v20, %v829_v41  ;;  %v935_v18 = vpop.permute.xlu2 %934 }
 0x22d   :  { %vm957_vm11 = vcmp.eq.s32.totalorder %v935_v18, %v1348_v29 }
 0x22e   :  { %v925_v53 = vadd.f32 %v917_v21, %v877_v48  ;;  %v965_v49 = vsel %vm957_vm11, 0.1, %v1209_v31 }
 0x230   :  { %v973_v30 = vadd.f32 %v965_v49, %v925_v53 }
 0x231   :  { %v854_v26 = vpop.permute.xlu1 %853 }
 0x232   :  { %1013 = vmatmul.f32.vlgmr.msra.gmra.mxu0 %v973_v30  ;;  %vm866_vm6 = vcmp.eq.s32.totalorder %v854_v26, %v1348_v29 }
 0x233   :  { %v874_v55 = vsel %vm866_vm6, 0.4, %v1209_v31 }
 0x234   :  { %v882_v22 = vadd.f32 %v874_v55, %v1983_v56 }
 0x235   :  { %v800_v54 = vpop.permute.xlu2 %799 }
 0x236   :  { %vm816_vm12 = vcmp.eq.s32.totalorder %v800_v54, %v1348_v29 }
 0x237   :  { %v824_v56 = vsel %vm816_vm12, 0.6, %v1209_v31 }
 0x238   :  { %v832_v43 = vadd.f32 %v824_v56, %v1898_v10 }
 0x23a   :  { %v893_v23 = vpop.permute.xlu1 %892 }
 0x23b   :  { %vm911_vm1 = vcmp.eq.s32.totalorder %v893_v23, %v1348_v29 }
 0x23c   :  { %v919_v52 = vsel %vm911_vm1, 0.25, %v1209_v31 }
 0x23d   :  { %v927_v16 = vadd.f32 %v919_v52, %v879_v61 }
 0x23e   :  { %v956_v38 = vpop.permute.xlu2 %955 }
 0x23f   :  { %v975_v25 = vadd.f32 %v967_v3, %v927_v16  ;;  %vm964_vm3 = vcmp.eq.s32.totalorder %v956_v38, %v1348_v29 }
 0x240   :  { %v972_v13 = vsel %vm964_vm3, 0.1, %v1209_v31 }
 0x241   :  { %1019 = vmatmul.f32.vlgmr.msra.gmra.mxu1 %v975_v25 }
 0x242   :  { %v908_v28 = vpop.permute.xlu1 %907 }
 0x243   :  { %vm916_vm4 = vcmp.eq.s32.totalorder %v908_v28, %v1348_v29 }
 0x244   :  { %v924_v50 = vsel %vm916_vm4, 0.25, %v1209_v31 }
 0x245   :  { %v932_v1 = vadd.f32 %v924_v50, %v884_v9 }
 0x247   :  { %v890_v46 = vpop.permute.xlu2 %889  ;;  %v980_v35 = vadd.f32 %v972_v13, %v932_v1 }
 0x248   :  { %vm910_vm7 = vcmp.eq.s32.totalorder %v890_v46, %v1348_v29 }
 0x249   :  { %1034 = vmatmul.f32.gmra.mxu3 %v980_v35  ;;  %v918_v12 = vsel %vm910_vm7, 0.25, %v1209_v31 }
 0x24b   :  { %v794_v2 = vpop.permute.xlu1 %793 }
 0x24c   :  { %vm814_vm8 = vcmp.eq.s32.totalorder %v794_v2, %v1348_v29 }
 0x24d   :  { %v822_v40 = vsel %vm814_vm8, 0.6, %v1209_v31 }
 0x24e   :  { %v830_v11 = vadd.f32 %v822_v40, %v1764_v15  ;;  %v930_v15 = vadd.f32 %v922_v24, %v882_v22 }
 0x250   :  { %v878_v14 = vadd.f32 %v870_v5, %v830_v11  ;;  %v938_v19 = vpop.permute.xlu2 %937 }
 0x251   :  { %vm958_vm10 = vcmp.eq.s32.totalorder %v938_v19, %v1348_v29 }
 0x252   :  { %v966_v27 = vsel %vm958_vm10, 0.1, %v1209_v31  ;;  %v926_v7 = vadd.f32 %v918_v12, %v878_v14 }
 0x254   :  { %v950_v6 = vpop.permute.xlu1 %949  ;;  %v974_v34 = vadd.f32 %v966_v27, %v926_v7 }
 0x255   :  { %vm962_vm11 = vcmp.eq.s32.totalorder %v950_v6, %v1348_v29 }
 0x256   :  { %v970_v17 = vsel %vm962_vm11, 0.1, %v1209_v31  ;;  %1016 = vmatmul.f32.gmra.mxu0 %v974_v34 }
 0x257   :  { %v978_v44 = vadd.f32 %v970_v17, %v930_v15 }
 0x259   :  { %1028 = vmatmul.f32.gmra.mxu2 %v978_v44 }
 0x25d   :  { %v848_v36 = vpop.permute.xlu1 %847 }
 0x25e   :  { %vm864_vm13 = vcmp.eq.s32.totalorder %v848_v36, %v1348_v29 }
 0x25f   :  { %v872_v39 = vsel %vm864_vm13, 0.4, %v1209_v31 }
 0x260   :  { %v880_v0 = vadd.f32 %v872_v39, %v832_v43 }
 0x266   :  { %v896_v45 = vpop.permute.xlu1 %895 }
 0x267   :  { %vm912_vm15 = vcmp.eq.s32.totalorder %v896_v45, %v1348_v29 }
 0x268   :  { %v920_v37 = vsel %vm912_vm15, 0.25, %v1209_v31 }
 0x269   :  { %v928_v32 = vadd.f32 %v920_v37, %v880_v0 }
 0x26b   :  { %v976_v41 = vadd.f32 %v968_v47, %v928_v32 }
 0x26d   :  { %1022 = vmatmul.f32.gmra.mxu1 %v976_v41 }
 0x288   :  { %v1026_v20 = vpop.f32.mrf.mxu2 }
 0x289   :  { %1042 = vst [vmem:[%s2088_s2 + $0x20] sm:$0xff] %v1026_v20 }
 0x2a8   :  { %v1032_v21 = vpop.f32.mrf.mxu3 }
 0x2a9   :  { %1044 = vst [vmem:[%s2088_s2 + $0x30] sm:$0xff] %v1032_v21 }
 0x2af   :  { %v1014_v10 = vpop.f32.mrf.mxu0 }
 0x2b0   :  { %1038 = vst [vmem:[%s2088_s2] sm:$0xff] %v1014_v10 }
 0x2be   :  { %v1020_v29 = vpop.f32.mrf.mxu1 }
 0x2bf   :  { %1040 = vst [vmem:[%s2088_s2 + $0x10] sm:$0xff] %v1020_v29 }
 0x2cc   :  { %v1035_v31 = vpop.f32.mrf.mxu3 }
 0x2cd   :  { %1045 = vst [vmem:[%s2088_s2 + $0x38] sm:$0xff] %v1035_v31 }
 0x2d3   :  { %v1017_v48 = vpop.f32.mrf.mxu0 }
 0x2d4   :  { %1039 = vst [vmem:[%s2088_s2 + $0x8] sm:$0xff] %v1017_v48 }
 0x2dc   :  { %v1029_v18 = vpop.f32.mrf.mxu2 }
 0x2dd   :  { %1043 = vst [vmem:[%s2088_s2 + $0x28] sm:$0xff] %v1029_v18 }
 0x2ea   :  { %v1023_v58 = vpop.f32.mrf.mxu1 }
 0x2eb   :  { %1041 = vst [vmem:[%s2088_s2 + $0x18] sm:$0xff] %v1023_v58 }

</bundles_post_ra>
